<compile_context>
chip_gen: v5e
topology: v5e:2x2
jax: 0.10.0
libtpu: 0.0.40
codegen_flags: <defaults>
</compile_context>

<pallas_src>
import jax
import jax.numpy as jnp
from jax.experimental import pallas as pl
from jax.experimental.pallas import tpu as pltpu

EPS = 1e-5  # torch.nn.LayerNorm default eps


def _round_up(x, m):
    return ((x + m - 1) // m) * m


def _interaction_kernel(x1_ref, x2_ref, w1_ref, w2_ref, b_ref, g_ref, be_ref, o_ref):
    """One (C, W, block_rows) tile.

    x1_ref, x2_ref, o_ref : VMEM (C, W, Br) -- rows on the lane axis (dense)
    w1_ref, w2_ref        : SMEM (C, C)     -- 1x1-conv weights (scalar reads)
    b_ref                 : SMEM (C,)       -- conv bias
    g_ref, be_ref         : VMEM (W, 1)     -- LayerNorm gamma / beta
    """
    C = x1_ref.shape[0]
    gamma = g_ref[...]            # (W, 1), broadcasts along lanes
    beta = be_ref[...]            # (W, 1)

    # Process one output channel at a time: the live set stays at a few
    # (W, Br) planes instead of a 4-D broadcast intermediate.
    for o in range(C):
        # 1x1 conv for output channel o: unrolled scalar * vector FMAs (VPU).
        y = None
        for c in range(C):
            x1c = x1_ref[c].astype(jnp.float32)
            x2c = x2_ref[c].astype(jnp.float32)
            term = x1c * w1_ref[o, c] + x2c * w2_ref[o, c]
            y = term if y is None else y + term
        y = y + b_ref[o]                                          # (W, Br)

        # LayerNorm over W (sublane axis), biased variance, eps = 1e-5,
        # matching torch.nn.LayerNorm; then affine + sigmoid.
        mean = jnp.mean(y, axis=0, keepdims=True)                 # (1, Br)
        var = jnp.mean(jnp.square(y - mean), axis=0, keepdims=True)
        normed = (y - mean) * jax.lax.rsqrt(var + EPS)
        mask = jax.nn.sigmoid(normed * gamma + beta)              # (W, Br)

        x1o = x1_ref[o].astype(jnp.float32)
        x2o = x2_ref[o].astype(jnp.float32)
        o_ref[o] = (x1o + x2o * mask).astype(o_ref.dtype)


def interaction_forward(input1, input2, params, *, block_rows=2048):
    """input1, input2: (N, C, H, W) float32. Returns (N, C, H, W)."""
    N, C, H, W = input1.shape
    w1, w2, bias, gamma, beta = params
    rows = N * H

    # Single relayout kept for lane density: NCHW -> (C, W, N*H).
    def to_kernel_layout(x):
        return jnp.transpose(x, (1, 3, 0, 2)).reshape(C, W, rows)

    x1 = to_kernel_layout(input1)
    x2 = to_kernel_layout(input2)

    # Lane-dense row blocks (multiples of 128 lanes); pad rows so the block
    # divides evenly -> no partial blocks, no divisibility assert.
    br = _round_up(max(128, min(block_rows, _round_up(rows, 128))), 128)
    rows_p = _round_up(rows, br)
    if rows_p != rows:
        pad = ((0, 0), (0, 0), (0, rows_p - rows))
        x1 = jnp.pad(x1, pad)
        x2 = jnp.pad(x2, pad)
    grid = (rows_p // br,)

    row_spec = pl.BlockSpec((C, W, br), lambda i: (0, 0, i))
    smem_spec = pl.BlockSpec(memory_space=pltpu.MemorySpace.SMEM)
    vec_spec = pl.BlockSpec((W, 1), lambda i: (0, 0))

    # VMEM budget: x1/x2/out blocks, double-buffered, plus headroom.
    block_bytes = C * W * br * input1.dtype.itemsize
    vmem_limit = int(min(48 * 1024 * 1024, max(16 * 1024 * 1024, 8 * block_bytes)))

    out = pl.pallas_call(
        _interaction_kernel,
        out_shape=jax.ShapeDtypeStruct((C, W, rows_p), input1.dtype),
        grid=grid,
        in_specs=[
            row_spec,        # x1   (C, W, rows_p)
            row_spec,        # x2   (C, W, rows_p)
            smem_spec,       # w1   (C, C)
            smem_spec,       # w2   (C, C)
            smem_spec,       # bias (C,)
            vec_spec,        # gamma (W, 1)
            vec_spec,        # beta  (W, 1)
        ],
        out_specs=row_spec,
        compiler_params=pltpu.CompilerParams(
            dimension_semantics=("parallel",),
            vmem_limit_bytes=vmem_limit,
        ),
    )(x1, x2, w1, w2, bias, gamma.reshape(W, 1), beta.reshape(W, 1))

    out = out[:, :, :rows]
    return jnp.transpose(out.reshape(C, W, N, H), (2, 0, 3, 1))


def interaction_reference(input1, input2, params):
    """Pure-JAX reference reproducing the PyTorch forward."""
    w1, w2, bias, gamma, beta = params
    y = (jnp.einsum("oc,nchw->nohw", w1, input1)
         + jnp.einsum("oc,nchw->nohw", w2, input2)
         + bias[None, :, None, None])
    mean = jnp.mean(y, axis=-1, keepdims=True)
    var = jnp.mean(jnp.square(y - mean), axis=-1, keepdims=True)
    normed = (y - mean) / jnp.sqrt(var + EPS) * gamma + beta
    mask = jax.nn.sigmoid(normed)
    return input1 + input2 * mask


def init_params(key, input_size, normsize):
    """Synthetic init matching nn.Conv2d(2C, C, 1) + nn.LayerNorm(normsize)."""
    C = input_size
    kw, kb, kg, kbe = jax.random.split(key, 4)
    fan_in = 2 * C  # kernel_size = 1x1
    bound = 1.0 / jnp.sqrt(fan_in)
    w_full = jax.random.uniform(kw, (C, 2 * C), jnp.float32, -bound, bound)  # (out, in)
    bias = jax.random.uniform(kb, (C,), jnp.float32, -bound, bound)
    w1 = w_full[:, :C]      # acts on input1's channels
    w2 = w_full[:, C:]      # acts on input2's channels
    # Non-trivial affine params so the gamma/beta path is exercised
    # (PyTorch defaults ones/zeros are a special case of this).
    gamma = 1.0 + 0.1 * jax.random.normal(kg, (normsize,), jnp.float32)
    beta = 0.1 * jax.random.normal(kbe, (normsize,), jnp.float32)
    return (w1, w2, bias, gamma, beta)


if __name__ == "__main__":
    input_size = 4    # C
    normsize = 16     # W (LayerNorm size)
    N, H = 2, 8

    key = jax.random.PRNGKey(0)
    k1, k2, kp = jax.random.split(key, 3)
    input1 = jax.random.normal(k1, (N, input_size, H, normsize), jnp.float32)
    input2 = jax.random.normal(k2, (N, input_size, H, normsize), jnp.float32)
    params = init_params(kp, input_size, normsize)

    out = jax.block_until_ready(interaction_forward(input1, input2, params))
    ref = interaction_reference(input1, input2, params)
    assert out.shape == input1.shape
    assert jnp.allclose(out, ref, atol=1e-5, rtol=1e-5), "mismatch vs reference"

    # Second small config exercising a multi-step grid + row padding.
    N2, H2 = 3, 50
    ka, kb = jax.random.split(jax.random.PRNGKey(1))
    a = jax.random.normal(ka, (N2, input_size, H2, normsize), jnp.float32)
    b = jax.random.normal(kb, (N2, input_size, H2, normsize), jnp.float32)
    out2 = jax.block_until_ready(interaction_forward(a, b, params, block_rows=128))
    ref2 = interaction_reference(a, b, params)
    assert jnp.allclose(out2, ref2, atol=1e-5, rtol=1e-5), "mismatch vs reference (tiled)"

    print("KERNEL_OK")
</pallas_src>

<mosaic_0001>
module attributes {stable_mosaic.version = 11 : i64} {
  func.func @_interaction_kernel(%arg0: i32, %arg1: memref<4x16x128xf32, #tpu.memory_space<vmem>>, %arg2: memref<4x16x128xf32, #tpu.memory_space<vmem>>, %arg3: memref<4x4xf32, #tpu.memory_space<smem>>, %arg4: memref<4x4xf32, #tpu.memory_space<smem>>, %arg5: memref<4xf32, #tpu.memory_space<smem>>, %arg6: memref<16x1xf32, #tpu.memory_space<vmem>>, %arg7: memref<16x1xf32, #tpu.memory_space<vmem>>, %arg8: memref<4x16x128xf32, #tpu.memory_space<vmem>>) attributes {dimension_semantics = [#tpu.dimension_semantics<parallel>], iteration_bounds = array<i64: 1>, scalar_prefetch = 0 : i64, scratch_operands = 0 : i64, tpu.core_type = #tpu.core_type<tc>, window_params = [{transform_indices = @transform_0, window_bounds = array<i64: 4, 16, 128>}, {transform_indices = @transform_1, window_bounds = array<i64: 4, 16, 128>}, {transform_indices = @transform_2, window_bounds = array<i64: 4, 4>}, {transform_indices = @transform_3, window_bounds = array<i64: 4, 4>}, {transform_indices = @transform_4, window_bounds = array<i64: 4>}, {pipeline_mode = #tpu.pipeline_mode<synchronous>, transform_indices = @transform_5, window_bounds = array<i64: 16, 1>}, {pipeline_mode = #tpu.pipeline_mode<synchronous>, transform_indices = @transform_6, window_bounds = array<i64: 16, 1>}, {transform_indices = @transform_7, window_bounds = array<i64: 4, 16, 128>}]} {
    %c0 = arith.constant 0 : index
    %c0_0 = arith.constant 0 : index
    %0 = vector.load %arg6[%c0, %c0_0] : memref<16x1xf32, #tpu.memory_space<vmem>>, vector<16x1xf32>
    %c0_1 = arith.constant 0 : index
    %c0_2 = arith.constant 0 : index
    %1 = vector.load %arg7[%c0_1, %c0_2] : memref<16x1xf32, #tpu.memory_space<vmem>>, vector<16x1xf32>
    %c0_3 = arith.constant 0 : index
    %c0_4 = arith.constant 0 : index
    %c0_5 = arith.constant 0 : index
    %2 = vector.load %arg1[%c0_3, %c0_4, %c0_5] : memref<4x16x128xf32, #tpu.memory_space<vmem>>, vector<1x16x128xf32>
    %3 = vector.shape_cast %2 : vector<1x16x128xf32> to vector<16x128xf32>
    %c0_6 = arith.constant 0 : index
    %c0_7 = arith.constant 0 : index
    %c0_8 = arith.constant 0 : index
    %4 = vector.load %arg2[%c0_6, %c0_7, %c0_8] : memref<4x16x128xf32, #tpu.memory_space<vmem>>, vector<1x16x128xf32>
    %5 = vector.shape_cast %4 : vector<1x16x128xf32> to vector<16x128xf32>
    %c0_9 = arith.constant 0 : index
    %c0_10 = arith.constant 0 : index
    %6 = memref.load %arg3[%c0_9, %c0_10] : memref<4x4xf32, #tpu.memory_space<smem>>
    %7 = vector.broadcast %6 : f32 to vector<16x128xf32>
    %8 = arith.mulf %3, %7 : vector<16x128xf32>
    %c0_11 = arith.constant 0 : index
    %c0_12 = arith.constant 0 : index
    %9 = memref.load %arg4[%c0_11, %c0_12] : memref<4x4xf32, #tpu.memory_space<smem>>
    %10 = vector.broadcast %9 : f32 to vector<16x128xf32>
    %11 = arith.mulf %5, %10 : vector<16x128xf32>
    %12 = arith.addf %8, %11 : vector<16x128xf32>
    %c1 = arith.constant 1 : index
    %c0_13 = arith.constant 0 : index
    %c0_14 = arith.constant 0 : index
    %13 = vector.load %arg1[%c1, %c0_13, %c0_14] : memref<4x16x128xf32, #tpu.memory_space<vmem>>, vector<1x16x128xf32>
    %14 = vector.shape_cast %13 : vector<1x16x128xf32> to vector<16x128xf32>
    %c1_15 = arith.constant 1 : index
    %c0_16 = arith.constant 0 : index
    %c0_17 = arith.constant 0 : index
    %15 = vector.load %arg2[%c1_15, %c0_16, %c0_17] : memref<4x16x128xf32, #tpu.memory_space<vmem>>, vector<1x16x128xf32>
    %16 = vector.shape_cast %15 : vector<1x16x128xf32> to vector<16x128xf32>
    %c0_18 = arith.constant 0 : index
    %c1_19 = arith.constant 1 : index
    %17 = memref.load %arg3[%c0_18, %c1_19] : memref<4x4xf32, #tpu.memory_space<smem>>
    %18 = vector.broadcast %17 : f32 to vector<16x128xf32>
    %19 = arith.mulf %14, %18 : vector<16x128xf32>
    %c0_20 = arith.constant 0 : index
    %c1_21 = arith.constant 1 : index
    %20 = memref.load %arg4[%c0_20, %c1_21] : memref<4x4xf32, #tpu.memory_space<smem>>
    %21 = vector.broadcast %20 : f32 to vector<16x128xf32>
    %22 = arith.mulf %16, %21 : vector<16x128xf32>
    %23 = arith.addf %19, %22 : vector<16x128xf32>
    %24 = arith.addf %12, %23 : vector<16x128xf32>
    %c2 = arith.constant 2 : index
    %c0_22 = arith.constant 0 : index
    %c0_23 = arith.constant 0 : index
    %25 = vector.load %arg1[%c2, %c0_22, %c0_23] : memref<4x16x128xf32, #tpu.memory_space<vmem>>, vector<1x16x128xf32>
    %26 = vector.shape_cast %25 : vector<1x16x128xf32> to vector<16x128xf32>
    %c2_24 = arith.constant 2 : index
    %c0_25 = arith.constant 0 : index
    %c0_26 = arith.constant 0 : index
    %27 = vector.load %arg2[%c2_24, %c0_25, %c0_26] : memref<4x16x128xf32, #tpu.memory_space<vmem>>, vector<1x16x128xf32>
    %28 = vector.shape_cast %27 : vector<1x16x128xf32> to vector<16x128xf32>
    %c0_27 = arith.constant 0 : index
    %c2_28 = arith.constant 2 : index
    %29 = memref.load %arg3[%c0_27, %c2_28] : memref<4x4xf32, #tpu.memory_space<smem>>
    %30 = vector.broadcast %29 : f32 to vector<16x128xf32>
    %31 = arith.mulf %26, %30 : vector<16x128xf32>
    %c0_29 = arith.constant 0 : index
    %c2_30 = arith.constant 2 : index
    %32 = memref.load %arg4[%c0_29, %c2_30] : memref<4x4xf32, #tpu.memory_space<smem>>
    %33 = vector.broadcast %32 : f32 to vector<16x128xf32>
    %34 = arith.mulf %28, %33 : vector<16x128xf32>
    %35 = arith.addf %31, %34 : vector<16x128xf32>
    %36 = arith.addf %24, %35 : vector<16x128xf32>
    %c3 = arith.constant 3 : index
    %c0_31 = arith.constant 0 : index
    %c0_32 = arith.constant 0 : index
    %37 = vector.load %arg1[%c3, %c0_31, %c0_32] : memref<4x16x128xf32, #tpu.memory_space<vmem>>, vector<1x16x128xf32>
    %38 = vector.shape_cast %37 : vector<1x16x128xf32> to vector<16x128xf32>
    %c3_33 = arith.constant 3 : index
    %c0_34 = arith.constant 0 : index
    %c0_35 = arith.constant 0 : index
    %39 = vector.load %arg2[%c3_33, %c0_34, %c0_35] : memref<4x16x128xf32, #tpu.memory_space<vmem>>, vector<1x16x128xf32>
    %40 = vector.shape_cast %39 : vector<1x16x128xf32> to vector<16x128xf32>
    %c0_36 = arith.constant 0 : index
    %c3_37 = arith.constant 3 : index
    %41 = memref.load %arg3[%c0_36, %c3_37] : memref<4x4xf32, #tpu.memory_space<smem>>
    %42 = vector.broadcast %41 : f32 to vector<16x128xf32>
    %43 = arith.mulf %38, %42 : vector<16x128xf32>
    %c0_38 = arith.constant 0 : index
    %c3_39 = arith.constant 3 : index
    %44 = memref.load %arg4[%c0_38, %c3_39] : memref<4x4xf32, #tpu.memory_space<smem>>
    %45 = vector.broadcast %44 : f32 to vector<16x128xf32>
    %46 = arith.mulf %40, %45 : vector<16x128xf32>
    %47 = arith.addf %43, %46 : vector<16x128xf32>
    %48 = arith.addf %36, %47 : vector<16x128xf32>
    %c0_40 = arith.constant 0 : index
    %49 = memref.load %arg5[%c0_40] : memref<4xf32, #tpu.memory_space<smem>>
    %50 = vector.broadcast %49 : f32 to vector<16x128xf32>
    %51 = arith.addf %48, %50 : vector<16x128xf32>
    %cst = arith.constant dense<0.000000e+00> : vector<128xf32>
    %52 = vector.multi_reduction <add>, %51, %cst [0] : vector<16x128xf32> to vector<128xf32>
    %53 = vector.shape_cast %52 : vector<128xf32> to vector<1x128xf32>
    %cst_41 = arith.constant 1.600000e+01 : f32
    %54 = vector.broadcast %cst_41 : f32 to vector<1x128xf32>
    %55 = arith.divf %53, %54 : vector<1x128xf32>
    %56 = vector.broadcast %55 : vector<1x128xf32> to vector<16x128xf32>
    %57 = arith.subf %51, %56 : vector<16x128xf32>
    %58 = arith.mulf %57, %57 : vector<16x128xf32>
    %cst_42 = arith.constant dense<0.000000e+00> : vector<128xf32>
    %59 = vector.multi_reduction <add>, %58, %cst_42 [0] : vector<16x128xf32> to vector<128xf32>
    %60 = vector.shape_cast %59 : vector<128xf32> to vector<1x128xf32>
    %cst_43 = arith.constant 1.600000e+01 : f32
    %61 = vector.broadcast %cst_43 : f32 to vector<1x128xf32>
    %62 = arith.divf %60, %61 : vector<1x128xf32>
    %63 = vector.broadcast %55 : vector<1x128xf32> to vector<16x128xf32>
    %64 = arith.subf %51, %63 : vector<16x128xf32>
    %cst_44 = arith.constant 9.99999974E-6 : f32
    %65 = vector.broadcast %cst_44 : f32 to vector<1x128xf32>
    %66 = arith.addf %62, %65 : vector<1x128xf32>
    %67 = math.rsqrt %66 : vector<1x128xf32>
    %68 = vector.broadcast %67 : vector<1x128xf32> to vector<16x128xf32>
    %69 = arith.mulf %64, %68 : vector<16x128xf32>
    %70 = vector.broadcast %0 : vector<16x1xf32> to vector<16x128xf32>
    %71 = arith.mulf %69, %70 : vector<16x128xf32>
    %72 = vector.broadcast %1 : vector<16x1xf32> to vector<16x128xf32>
    %73 = arith.addf %71, %72 : vector<16x128xf32>
    %74 = arith.negf %73 : vector<16x128xf32>
    %75 = math.exp %74 : vector<16x128xf32>
    %cst_45 = arith.constant 1.000000e+00 : f32
    %76 = vector.broadcast %cst_45 : f32 to vector<16x128xf32>
    %77 = arith.addf %76, %75 : vector<16x128xf32>
    %78 = arith.divf %76, %77 : vector<16x128xf32>
    %c0_46 = arith.constant 0 : index
    %c0_47 = arith.constant 0 : index
    %c0_48 = arith.constant 0 : index
    %79 = vector.load %arg1[%c0_46, %c0_47, %c0_48] : memref<4x16x128xf32, #tpu.memory_space<vmem>>, vector<1x16x128xf32>
    %80 = vector.shape_cast %79 : vector<1x16x128xf32> to vector<16x128xf32>
    %c0_49 = arith.constant 0 : index
    %c0_50 = arith.constant 0 : index
    %c0_51 = arith.constant 0 : index
    %81 = vector.load %arg2[%c0_49, %c0_50, %c0_51] : memref<4x16x128xf32, #tpu.memory_space<vmem>>, vector<1x16x128xf32>
    %82 = vector.shape_cast %81 : vector<1x16x128xf32> to vector<16x128xf32>
    %83 = arith.mulf %82, %78 : vector<16x128xf32>
    %84 = arith.addf %80, %83 : vector<16x128xf32>
    %c0_52 = arith.constant 0 : index
    %c0_53 = arith.constant 0 : index
    %c0_54 = arith.constant 0 : index
    %85 = vector.load %arg8[%c0_52, %c0_53, %c0_54] : memref<4x16x128xf32, #tpu.memory_space<vmem>>, vector<1x16x128xf32>
    %86 = vector.shape_cast %85 : vector<1x16x128xf32> to vector<16x128xf32>
    %87 = vector.shape_cast %84 : vector<16x128xf32> to vector<1x16x128xf32>
    tpu.vector_store %arg8[%c0_52, %c0_53, %c0_54], %87 {strides = array<i32>} : memref<4x16x128xf32, #tpu.memory_space<vmem>>, vector<1x16x128xf32>,
    %c0_55 = arith.constant 0 : index
    %c0_56 = arith.constant 0 : index
    %c0_57 = arith.constant 0 : index
    %88 = vector.load %arg1[%c0_55, %c0_56, %c0_57] : memref<4x16x128xf32, #tpu.memory_space<vmem>>, vector<1x16x128xf32>
    %89 = vector.shape_cast %88 : vector<1x16x128xf32> to vector<16x128xf32>
    %c0_58 = arith.constant 0 : index
    %c0_59 = arith.constant 0 : index
    %c0_60 = arith.constant 0 : index
    %90 = vector.load %arg2[%c0_58, %c0_59, %c0_60] : memref<4x16x128xf32, #tpu.memory_space<vmem>>, vector<1x16x128xf32>
    %91 = vector.shape_cast %90 : vector<1x16x128xf32> to vector<16x128xf32>
    %c1_61 = arith.constant 1 : index
    %c0_62 = arith.constant 0 : index
    %92 = memref.load %arg3[%c1_61, %c0_62] : memref<4x4xf32, #tpu.memory_space<smem>>
    %93 = vector.broadcast %92 : f32 to vector<16x128xf32>
    %94 = arith.mulf %89, %93 : vector<16x128xf32>
    %c1_63 = arith.constant 1 : index
    %c0_64 = arith.constant 0 : index
    %95 = memref.load %arg4[%c1_63, %c0_64] : memref<4x4xf32, #tpu.memory_space<smem>>
    %96 = vector.broadcast %95 : f32 to vector<16x128xf32>
    %97 = arith.mulf %91, %96 : vector<16x128xf32>
    %98 = arith.addf %94, %97 : vector<16x128xf32>
    %c1_65 = arith.constant 1 : index
    %c0_66 = arith.constant 0 : index
    %c0_67 = arith.constant 0 : index
    %99 = vector.load %arg1[%c1_65, %c0_66, %c0_67] : memref<4x16x128xf32, #tpu.memory_space<vmem>>, vector<1x16x128xf32>
    %100 = vector.shape_cast %99 : vector<1x16x128xf32> to vector<16x128xf32>
    %c1_68 = arith.constant 1 : index
    %c0_69 = arith.constant 0 : index
    %c0_70 = arith.constant 0 : index
    %101 = vector.load %arg2[%c1_68, %c0_69, %c0_70] : memref<4x16x128xf32, #tpu.memory_space<vmem>>, vector<1x16x128xf32>
    %102 = vector.shape_cast %101 : vector<1x16x128xf32> to vector<16x128xf32>
    %c1_71 = arith.constant 1 : index
    %c1_72 = arith.constant 1 : index
    %103 = memref.load %arg3[%c1_71, %c1_72] : memref<4x4xf32, #tpu.memory_space<smem>>
    %104 = vector.broadcast %103 : f32 to vector<16x128xf32>
    %105 = arith.mulf %100, %104 : vector<16x128xf32>
    %c1_73 = arith.constant 1 : index
    %c1_74 = arith.constant 1 : index
    %106 = memref.load %arg4[%c1_73, %c1_74] : memref<4x4xf32, #tpu.memory_space<smem>>
    %107 = vector.broadcast %106 : f32 to vector<16x128xf32>
    %108 = arith.mulf %102, %107 : vector<16x128xf32>
    %109 = arith.addf %105, %108 : vector<16x128xf32>
    %110 = arith.addf %98, %109 : vector<16x128xf32>
    %c2_75 = arith.constant 2 : index
    %c0_76 = arith.constant 0 : index
    %c0_77 = arith.constant 0 : index
    %111 = vector.load %arg1[%c2_75, %c0_76, %c0_77] : memref<4x16x128xf32, #tpu.memory_space<vmem>>, vector<1x16x128xf32>
    %112 = vector.shape_cast %111 : vector<1x16x128xf32> to vector<16x128xf32>
    %c2_78 = arith.constant 2 : index
    %c0_79 = arith.constant 0 : index
    %c0_80 = arith.constant 0 : index
    %113 = vector.load %arg2[%c2_78, %c0_79, %c0_80] : memref<4x16x128xf32, #tpu.memory_space<vmem>>, vector<1x16x128xf32>
    %114 = vector.shape_cast %113 : vector<1x16x128xf32> to vector<16x128xf32>
    %c1_81 = arith.constant 1 : index
    %c2_82 = arith.constant 2 : index
    %115 = memref.load %arg3[%c1_81, %c2_82] : memref<4x4xf32, #tpu.memory_space<smem>>
    %116 = vector.broadcast %115 : f32 to vector<16x128xf32>
    %117 = arith.mulf %112, %116 : vector<16x128xf32>
    %c1_83 = arith.constant 1 : index
    %c2_84 = arith.constant 2 : index
    %118 = memref.load %arg4[%c1_83, %c2_84] : memref<4x4xf32, #tpu.memory_space<smem>>
    %119 = vector.broadcast %118 : f32 to vector<16x128xf32>
    %120 = arith.mulf %114, %119 : vector<16x128xf32>
    %121 = arith.addf %117, %120 : vector<16x128xf32>
    %122 = arith.addf %110, %121 : vector<16x128xf32>
    %c3_85 = arith.constant 3 : index
    %c0_86 = arith.constant 0 : index
    %c0_87 = arith.constant 0 : index
    %123 = vector.load %arg1[%c3_85, %c0_86, %c0_87] : memref<4x16x128xf32, #tpu.memory_space<vmem>>, vector<1x16x128xf32>
    %124 = vector.shape_cast %123 : vector<1x16x128xf32> to vector<16x128xf32>
    %c3_88 = arith.constant 3 : index
    %c0_89 = arith.constant 0 : index
    %c0_90 = arith.constant 0 : index
    %125 = vector.load %arg2[%c3_88, %c0_89, %c0_90] : memref<4x16x128xf32, #tpu.memory_space<vmem>>, vector<1x16x128xf32>
    %126 = vector.shape_cast %125 : vector<1x16x128xf32> to vector<16x128xf32>
    %c1_91 = arith.constant 1 : index
    %c3_92 = arith.constant 3 : index
    %127 = memref.load %arg3[%c1_91, %c3_92] : memref<4x4xf32, #tpu.memory_space<smem>>
    %128 = vector.broadcast %127 : f32 to vector<16x128xf32>
    %129 = arith.mulf %124, %128 : vector<16x128xf32>
    %c1_93 = arith.constant 1 : index
    %c3_94 = arith.constant 3 : index
    %130 = memref.load %arg4[%c1_93, %c3_94] : memref<4x4xf32, #tpu.memory_space<smem>>
    %131 = vector.broadcast %130 : f32 to vector<16x128xf32>
    %132 = arith.mulf %126, %131 : vector<16x128xf32>
    %133 = arith.addf %129, %132 : vector<16x128xf32>
    %134 = arith.addf %122, %133 : vector<16x128xf32>
    %c1_95 = arith.constant 1 : index
    %135 = memref.load %arg5[%c1_95] : memref<4xf32, #tpu.memory_space<smem>>
    %136 = vector.broadcast %135 : f32 to vector<16x128xf32>
    %137 = arith.addf %134, %136 : vector<16x128xf32>
    %cst_96 = arith.constant dense<0.000000e+00> : vector<128xf32>
    %138 = vector.multi_reduction <add>, %137, %cst_96 [0] : vector<16x128xf32> to vector<128xf32>
    %139 = vector.shape_cast %138 : vector<128xf32> to vector<1x128xf32>
    %cst_97 = arith.constant 1.600000e+01 : f32
    %140 = vector.broadcast %cst_97 : f32 to vector<1x128xf32>
    %141 = arith.divf %139, %140 : vector<1x128xf32>
    %142 = vector.broadcast %141 : vector<1x128xf32> to vector<16x128xf32>
    %143 = arith.subf %137, %142 : vector<16x128xf32>
    %144 = arith.mulf %143, %143 : vector<16x128xf32>
    %cst_98 = arith.constant dense<0.000000e+00> : vector<128xf32>
    %145 = vector.multi_reduction <add>, %144, %cst_98 [0] : vector<16x128xf32> to vector<128xf32>
    %146 = vector.shape_cast %145 : vector<128xf32> to vector<1x128xf32>
    %cst_99 = arith.constant 1.600000e+01 : f32
    %147 = vector.broadcast %cst_99 : f32 to vector<1x128xf32>
    %148 = arith.divf %146, %147 : vector<1x128xf32>
    %149 = vector.broadcast %141 : vector<1x128xf32> to vector<16x128xf32>
    %150 = arith.subf %137, %149 : vector<16x128xf32>
    %cst_100 = arith.constant 9.99999974E-6 : f32
    %151 = vector.broadcast %cst_100 : f32 to vector<1x128xf32>
    %152 = arith.addf %148, %151 : vector<1x128xf32>
    %153 = math.rsqrt %152 : vector<1x128xf32>
    %154 = vector.broadcast %153 : vector<1x128xf32> to vector<16x128xf32>
    %155 = arith.mulf %150, %154 : vector<16x128xf32>
    %156 = vector.broadcast %0 : vector<16x1xf32> to vector<16x128xf32>
    %157 = arith.mulf %155, %156 : vector<16x128xf32>
    %158 = vector.broadcast %1 : vector<16x1xf32> to vector<16x128xf32>
    %159 = arith.addf %157, %158 : vector<16x128xf32>
    %160 = arith.negf %159 : vector<16x128xf32>
    %161 = math.exp %160 : vector<16x128xf32>
    %cst_101 = arith.constant 1.000000e+00 : f32
    %162 = vector.broadcast %cst_101 : f32 to vector<16x128xf32>
    %163 = arith.addf %162, %161 : vector<16x128xf32>
    %164 = arith.divf %162, %163 : vector<16x128xf32>
    %c1_102 = arith.constant 1 : index
    %c0_103 = arith.constant 0 : index
    %c0_104 = arith.constant 0 : index
    %165 = vector.load %arg1[%c1_102, %c0_103, %c0_104] : memref<4x16x128xf32, #tpu.memory_space<vmem>>, vector<1x16x128xf32>
    %166 = vector.shape_cast %165 : vector<1x16x128xf32> to vector<16x128xf32>
    %c1_105 = arith.constant 1 : index
    %c0_106 = arith.constant 0 : index
    %c0_107 = arith.constant 0 : index
    %167 = vector.load %arg2[%c1_105, %c0_106, %c0_107] : memref<4x16x128xf32, #tpu.memory_space<vmem>>, vector<1x16x128xf32>
    %168 = vector.shape_cast %167 : vector<1x16x128xf32> to vector<16x128xf32>
    %169 = arith.mulf %168, %164 : vector<16x128xf32>
    %170 = arith.addf %166, %169 : vector<16x128xf32>
    %c1_108 = arith.constant 1 : index
    %c0_109 = arith.constant 0 : index
    %c0_110 = arith.constant 0 : index
    %171 = vector.load %arg8[%c1_108, %c0_109, %c0_110] : memref<4x16x128xf32, #tpu.memory_space<vmem>>, vector<1x16x128xf32>
    %172 = vector.shape_cast %171 : vector<1x16x128xf32> to vector<16x128xf32>
    %173 = vector.shape_cast %170 : vector<16x128xf32> to vector<1x16x128xf32>
    tpu.vector_store %arg8[%c1_108, %c0_109, %c0_110], %173 {strides = array<i32>} : memref<4x16x128xf32, #tpu.memory_space<vmem>>, vector<1x16x128xf32>,
    %c0_111 = arith.constant 0 : index
    %c0_112 = arith.constant 0 : index
    %c0_113 = arith.constant 0 : index
    %174 = vector.load %arg1[%c0_111, %c0_112, %c0_113] : memref<4x16x128xf32, #tpu.memory_space<vmem>>, vector<1x16x128xf32>
    %175 = vector.shape_cast %174 : vector<1x16x128xf32> to vector<16x128xf32>
    %c0_114 = arith.constant 0 : index
    %c0_115 = arith.constant 0 : index
    %c0_116 = arith.constant 0 : index
    %176 = vector.load %arg2[%c0_114, %c0_115, %c0_116] : memref<4x16x128xf32, #tpu.memory_space<vmem>>, vector<1x16x128xf32>
    %177 = vector.shape_cast %176 : vector<1x16x128xf32> to vector<16x128xf32>
    %c2_117 = arith.constant 2 : index
    %c0_118 = arith.constant 0 : index
    %178 = memref.load %arg3[%c2_117, %c0_118] : memref<4x4xf32, #tpu.memory_space<smem>>
    %179 = vector.broadcast %178 : f32 to vector<16x128xf32>
    %180 = arith.mulf %175, %179 : vector<16x128xf32>
    %c2_119 = arith.constant 2 : index
    %c0_120 = arith.constant 0 : index
    %181 = memref.load %arg4[%c2_119, %c0_120] : memref<4x4xf32, #tpu.memory_space<smem>>
    %182 = vector.broadcast %181 : f32 to vector<16x128xf32>
    %183 = arith.mulf %177, %182 : vector<16x128xf32>
    %184 = arith.addf %180, %183 : vector<16x128xf32>
    %c1_121 = arith.constant 1 : index
    %c0_122 = arith.constant 0 : index
    %c0_123 = arith.constant 0 : index
    %185 = vector.load %arg1[%c1_121, %c0_122, %c0_123] : memref<4x16x128xf32, #tpu.memory_space<vmem>>, vector<1x16x128xf32>
    %186 = vector.shape_cast %185 : vector<1x16x128xf32> to vector<16x128xf32>
    %c1_124 = arith.constant 1 : index
    %c0_125 = arith.constant 0 : index
    %c0_126 = arith.constant 0 : index
    %187 = vector.load %arg2[%c1_124, %c0_125, %c0_126] : memref<4x16x128xf32, #tpu.memory_space<vmem>>, vector<1x16x128xf32>
    %188 = vector.shape_cast %187 : vector<1x16x128xf32> to vector<16x128xf32>
    %c2_127 = arith.constant 2 : index
    %c1_128 = arith.constant 1 : index
    %189 = memref.load %arg3[%c2_127, %c1_128] : memref<4x4xf32, #tpu.memory_space<smem>>
    %190 = vector.broadcast %189 : f32 to vector<16x128xf32>
    %191 = arith.mulf %186, %190 : vector<16x128xf32>
    %c2_129 = arith.constant 2 : index
    %c1_130 = arith.constant 1 : index
    %192 = memref.load %arg4[%c2_129, %c1_130] : memref<4x4xf32, #tpu.memory_space<smem>>
    %193 = vector.broadcast %192 : f32 to vector<16x128xf32>
    %194 = arith.mulf %188, %193 : vector<16x128xf32>
    %195 = arith.addf %191, %194 : vector<16x128xf32>
    %196 = arith.addf %184, %195 : vector<16x128xf32>
    %c2_131 = arith.constant 2 : index
    %c0_132 = arith.constant 0 : index
    %c0_133 = arith.constant 0 : index
    %197 = vector.load %arg1[%c2_131, %c0_132, %c0_133] : memref<4x16x128xf32, #tpu.memory_space<vmem>>, vector<1x16x128xf32>
    %198 = vector.shape_cast %197 : vector<1x16x128xf32> to vector<16x128xf32>
    %c2_134 = arith.constant 2 : index
    %c0_135 = arith.constant 0 : index
    %c0_136 = arith.constant 0 : index
    %199 = vector.load %arg2[%c2_134, %c0_135, %c0_136] : memref<4x16x128xf32, #tpu.memory_space<vmem>>, vector<1x16x128xf32>
    %200 = vector.shape_cast %199 : vector<1x16x128xf32> to vector<16x128xf32>
    %c2_137 = arith.constant 2 : index
    %c2_138 = arith.constant 2 : index
    %201 = memref.load %arg3[%c2_137, %c2_138] : memref<4x4xf32, #tpu.memory_space<smem>>
    %202 = vector.broadcast %201 : f32 to vector<16x128xf32>
    %203 = arith.mulf %198, %202 : vector<16x128xf32>
    %c2_139 = arith.constant 2 : index
    %c2_140 = arith.constant 2 : index
    %204 = memref.load %arg4[%c2_139, %c2_140] : memref<4x4xf32, #tpu.memory_space<smem>>
    %205 = vector.broadcast %204 : f32 to vector<16x128xf32>
    %206 = arith.mulf %200, %205 : vector<16x128xf32>
    %207 = arith.addf %203, %206 : vector<16x128xf32>
    %208 = arith.addf %196, %207 : vector<16x128xf32>
    %c3_141 = arith.constant 3 : index
    %c0_142 = arith.constant 0 : index
    %c0_143 = arith.constant 0 : index
    %209 = vector.load %arg1[%c3_141, %c0_142, %c0_143] : memref<4x16x128xf32, #tpu.memory_space<vmem>>, vector<1x16x128xf32>
    %210 = vector.shape_cast %209 : vector<1x16x128xf32> to vector<16x128xf32>
    %c3_144 = arith.constant 3 : index
    %c0_145 = arith.constant 0 : index
    %c0_146 = arith.constant 0 : index
    %211 = vector.load %arg2[%c3_144, %c0_145, %c0_146] : memref<4x16x128xf32, #tpu.memory_space<vmem>>, vector<1x16x128xf32>
    %212 = vector.shape_cast %211 : vector<1x16x128xf32> to vector<16x128xf32>
    %c2_147 = arith.constant 2 : index
    %c3_148 = arith.constant 3 : index
    %213 = memref.load %arg3[%c2_147, %c3_148] : memref<4x4xf32, #tpu.memory_space<smem>>
    %214 = vector.broadcast %213 : f32 to vector<16x128xf32>
    %215 = arith.mulf %210, %214 : vector<16x128xf32>
    %c2_149 = arith.constant 2 : index
    %c3_150 = arith.constant 3 : index
    %216 = memref.load %arg4[%c2_149, %c3_150] : memref<4x4xf32, #tpu.memory_space<smem>>
    %217 = vector.broadcast %216 : f32 to vector<16x128xf32>
    %218 = arith.mulf %212, %217 : vector<16x128xf32>
    %219 = arith.addf %215, %218 : vector<16x128xf32>
    %220 = arith.addf %208, %219 : vector<16x128xf32>
    %c2_151 = arith.constant 2 : index
    %221 = memref.load %arg5[%c2_151] : memref<4xf32, #tpu.memory_space<smem>>
    %222 = vector.broadcast %221 : f32 to vector<16x128xf32>
    %223 = arith.addf %220, %222 : vector<16x128xf32>
    %cst_152 = arith.constant dense<0.000000e+00> : vector<128xf32>
    %224 = vector.multi_reduction <add>, %223, %cst_152 [0] : vector<16x128xf32> to vector<128xf32>
    %225 = vector.shape_cast %224 : vector<128xf32> to vector<1x128xf32>
    %cst_153 = arith.constant 1.600000e+01 : f32
    %226 = vector.broadcast %cst_153 : f32 to vector<1x128xf32>
    %227 = arith.divf %225, %226 : vector<1x128xf32>
    %228 = vector.broadcast %227 : vector<1x128xf32> to vector<16x128xf32>
    %229 = arith.subf %223, %228 : vector<16x128xf32>
    %230 = arith.mulf %229, %229 : vector<16x128xf32>
    %cst_154 = arith.constant dense<0.000000e+00> : vector<128xf32>
    %231 = vector.multi_reduction <add>, %230, %cst_154 [0] : vector<16x128xf32> to vector<128xf32>
    %232 = vector.shape_cast %231 : vector<128xf32> to vector<1x128xf32>
    %cst_155 = arith.constant 1.600000e+01 : f32
    %233 = vector.broadcast %cst_155 : f32 to vector<1x128xf32>
    %234 = arith.divf %232, %233 : vector<1x128xf32>
    %235 = vector.broadcast %227 : vector<1x128xf32> to vector<16x128xf32>
    %236 = arith.subf %223, %235 : vector<16x128xf32>
    %cst_156 = arith.constant 9.99999974E-6 : f32
    %237 = vector.broadcast %cst_156 : f32 to vector<1x128xf32>
    %238 = arith.addf %234, %237 : vector<1x128xf32>
    %239 = math.rsqrt %238 : vector<1x128xf32>
    %240 = vector.broadcast %239 : vector<1x128xf32> to vector<16x128xf32>
    %241 = arith.mulf %236, %240 : vector<16x128xf32>
    %242 = vector.broadcast %0 : vector<16x1xf32> to vector<16x128xf32>
    %243 = arith.mulf %241, %242 : vector<16x128xf32>
    %244 = vector.broadcast %1 : vector<16x1xf32> to vector<16x128xf32>
    %245 = arith.addf %243, %244 : vector<16x128xf32>
    %246 = arith.negf %245 : vector<16x128xf32>
    %247 = math.exp %246 : vector<16x128xf32>
    %cst_157 = arith.constant 1.000000e+00 : f32
    %248 = vector.broadcast %cst_157 : f32 to vector<16x128xf32>
    %249 = arith.addf %248, %247 : vector<16x128xf32>
    %250 = arith.divf %248, %249 : vector<16x128xf32>
    %c2_158 = arith.constant 2 : index
    %c0_159 = arith.constant 0 : index
    %c0_160 = arith.constant 0 : index
    %251 = vector.load %arg1[%c2_158, %c0_159, %c0_160] : memref<4x16x128xf32, #tpu.memory_space<vmem>>, vector<1x16x128xf32>
    %252 = vector.shape_cast %251 : vector<1x16x128xf32> to vector<16x128xf32>
    %c2_161 = arith.constant 2 : index
    %c0_162 = arith.constant 0 : index
    %c0_163 = arith.constant 0 : index
    %253 = vector.load %arg2[%c2_161, %c0_162, %c0_163] : memref<4x16x128xf32, #tpu.memory_space<vmem>>, vector<1x16x128xf32>
    %254 = vector.shape_cast %253 : vector<1x16x128xf32> to vector<16x128xf32>
    %255 = arith.mulf %254, %250 : vector<16x128xf32>
    %256 = arith.addf %252, %255 : vector<16x128xf32>
    %c2_164 = arith.constant 2 : index
    %c0_165 = arith.constant 0 : index
    %c0_166 = arith.constant 0 : index
    %257 = vector.load %arg8[%c2_164, %c0_165, %c0_166] : memref<4x16x128xf32, #tpu.memory_space<vmem>>, vector<1x16x128xf32>
    %258 = vector.shape_cast %257 : vector<1x16x128xf32> to vector<16x128xf32>
    %259 = vector.shape_cast %256 : vector<16x128xf32> to vector<1x16x128xf32>
    tpu.vector_store %arg8[%c2_164, %c0_165, %c0_166], %259 {strides = array<i32>} : memref<4x16x128xf32, #tpu.memory_space<vmem>>, vector<1x16x128xf32>,
    %c0_167 = arith.constant 0 : index
    %c0_168 = arith.constant 0 : index
    %c0_169 = arith.constant 0 : index
    %260 = vector.load %arg1[%c0_167, %c0_168, %c0_169] : memref<4x16x128xf32, #tpu.memory_space<vmem>>, vector<1x16x128xf32>
    %261 = vector.shape_cast %260 : vector<1x16x128xf32> to vector<16x128xf32>
    %c0_170 = arith.constant 0 : index
    %c0_171 = arith.constant 0 : index
    %c0_172 = arith.constant 0 : index
    %262 = vector.load %arg2[%c0_170, %c0_171, %c0_172] : memref<4x16x128xf32, #tpu.memory_space<vmem>>, vector<1x16x128xf32>
    %263 = vector.shape_cast %262 : vector<1x16x128xf32> to vector<16x128xf32>
    %c3_173 = arith.constant 3 : index
    %c0_174 = arith.constant 0 : index
    %264 = memref.load %arg3[%c3_173, %c0_174] : memref<4x4xf32, #tpu.memory_space<smem>>
    %265 = vector.broadcast %264 : f32 to vector<16x128xf32>
    %266 = arith.mulf %261, %265 : vector<16x128xf32>
    %c3_175 = arith.constant 3 : index
    %c0_176 = arith.constant 0 : index
    %267 = memref.load %arg4[%c3_175, %c0_176] : memref<4x4xf32, #tpu.memory_space<smem>>
    %268 = vector.broadcast %267 : f32 to vector<16x128xf32>
    %269 = arith.mulf %263, %268 : vector<16x128xf32>
    %270 = arith.addf %266, %269 : vector<16x128xf32>
    %c1_177 = arith.constant 1 : index
    %c0_178 = arith.constant 0 : index
    %c0_179 = arith.constant 0 : index
    %271 = vector.load %arg1[%c1_177, %c0_178, %c0_179] : memref<4x16x128xf32, #tpu.memory_space<vmem>>, vector<1x16x128xf32>
    %272 = vector.shape_cast %271 : vector<1x16x128xf32> to vector<16x128xf32>
    %c1_180 = arith.constant 1 : index
    %c0_181 = arith.constant 0 : index
    %c0_182 = arith.constant 0 : index
    %273 = vector.load %arg2[%c1_180, %c0_181, %c0_182] : memref<4x16x128xf32, #tpu.memory_space<vmem>>, vector<1x16x128xf32>
    %274 = vector.shape_cast %273 : vector<1x16x128xf32> to vector<16x128xf32>
    %c3_183 = arith.constant 3 : index
    %c1_184 = arith.constant 1 : index
    %275 = memref.load %arg3[%c3_183, %c1_184] : memref<4x4xf32, #tpu.memory_space<smem>>
    %276 = vector.broadcast %275 : f32 to vector<16x128xf32>
    %277 = arith.mulf %272, %276 : vector<16x128xf32>
    %c3_185 = arith.constant 3 : index
    %c1_186 = arith.constant 1 : index
    %278 = memref.load %arg4[%c3_185, %c1_186] : memref<4x4xf32, #tpu.memory_space<smem>>
    %279 = vector.broadcast %278 : f32 to vector<16x128xf32>
    %280 = arith.mulf %274, %279 : vector<16x128xf32>
    %281 = arith.addf %277, %280 : vector<16x128xf32>
    %282 = arith.addf %270, %281 : vector<16x128xf32>
    %c2_187 = arith.constant 2 : index
    %c0_188 = arith.constant 0 : index
    %c0_189 = arith.constant 0 : index
    %283 = vector.load %arg1[%c2_187, %c0_188, %c0_189] : memref<4x16x128xf32, #tpu.memory_space<vmem>>, vector<1x16x128xf32>
    %284 = vector.shape_cast %283 : vector<1x16x128xf32> to vector<16x128xf32>
    %c2_190 = arith.constant 2 : index
    %c0_191 = arith.constant 0 : index
    %c0_192 = arith.constant 0 : index
    %285 = vector.load %arg2[%c2_190, %c0_191, %c0_192] : memref<4x16x128xf32, #tpu.memory_space<vmem>>, vector<1x16x128xf32>
    %286 = vector.shape_cast %285 : vector<1x16x128xf32> to vector<16x128xf32>
    %c3_193 = arith.constant 3 : index
    %c2_194 = arith.constant 2 : index
    %287 = memref.load %arg3[%c3_193, %c2_194] : memref<4x4xf32, #tpu.memory_space<smem>>
    %288 = vector.broadcast %287 : f32 to vector<16x128xf32>
    %289 = arith.mulf %284, %288 : vector<16x128xf32>
    %c3_195 = arith.constant 3 : index
    %c2_196 = arith.constant 2 : index
    %290 = memref.load %arg4[%c3_195, %c2_196] : memref<4x4xf32, #tpu.memory_space<smem>>
    %291 = vector.broadcast %290 : f32 to vector<16x128xf32>
    %292 = arith.mulf %286, %291 : vector<16x128xf32>
    %293 = arith.addf %289, %292 : vector<16x128xf32>
    %294 = arith.addf %282, %293 : vector<16x128xf32>
    %c3_197 = arith.constant 3 : index
    %c0_198 = arith.constant 0 : index
    %c0_199 = arith.constant 0 : index
    %295 = vector.load %arg1[%c3_197, %c0_198, %c0_199] : memref<4x16x128xf32, #tpu.memory_space<vmem>>, vector<1x16x128xf32>
    %296 = vector.shape_cast %295 : vector<1x16x128xf32> to vector<16x128xf32>
    %c3_200 = arith.constant 3 : index
    %c0_201 = arith.constant 0 : index
    %c0_202 = arith.constant 0 : index
    %297 = vector.load %arg2[%c3_200, %c0_201, %c0_202] : memref<4x16x128xf32, #tpu.memory_space<vmem>>, vector<1x16x128xf32>
    %298 = vector.shape_cast %297 : vector<1x16x128xf32> to vector<16x128xf32>
    %c3_203 = arith.constant 3 : index
    %c3_204 = arith.constant 3 : index
    %299 = memref.load %arg3[%c3_203, %c3_204] : memref<4x4xf32, #tpu.memory_space<smem>>
    %300 = vector.broadcast %299 : f32 to vector<16x128xf32>
    %301 = arith.mulf %296, %300 : vector<16x128xf32>
    %c3_205 = arith.constant 3 : index
    %c3_206 = arith.constant 3 : index
    %302 = memref.load %arg4[%c3_205, %c3_206] : memref<4x4xf32, #tpu.memory_space<smem>>
    %303 = vector.broadcast %302 : f32 to vector<16x128xf32>
    %304 = arith.mulf %298, %303 : vector<16x128xf32>
    %305 = arith.addf %301, %304 : vector<16x128xf32>
    %306 = arith.addf %294, %305 : vector<16x128xf32>
    %c3_207 = arith.constant 3 : index
    %307 = memref.load %arg5[%c3_207] : memref<4xf32, #tpu.memory_space<smem>>
    %308 = vector.broadcast %307 : f32 to vector<16x128xf32>
    %309 = arith.addf %306, %308 : vector<16x128xf32>
    %cst_208 = arith.constant dense<0.000000e+00> : vector<128xf32>
    %310 = vector.multi_reduction <add>, %309, %cst_208 [0] : vector<16x128xf32> to vector<128xf32>
    %311 = vector.shape_cast %310 : vector<128xf32> to vector<1x128xf32>
    %cst_209 = arith.constant 1.600000e+01 : f32
    %312 = vector.broadcast %cst_209 : f32 to vector<1x128xf32>
    %313 = arith.divf %311, %312 : vector<1x128xf32>
    %314 = vector.broadcast %313 : vector<1x128xf32> to vector<16x128xf32>
    %315 = arith.subf %309, %314 : vector<16x128xf32>
    %316 = arith.mulf %315, %315 : vector<16x128xf32>
    %cst_210 = arith.constant dense<0.000000e+00> : vector<128xf32>
    %317 = vector.multi_reduction <add>, %316, %cst_210 [0] : vector<16x128xf32> to vector<128xf32>
    %318 = vector.shape_cast %317 : vector<128xf32> to vector<1x128xf32>
    %cst_211 = arith.constant 1.600000e+01 : f32
    %319 = vector.broadcast %cst_211 : f32 to vector<1x128xf32>
    %320 = arith.divf %318, %319 : vector<1x128xf32>
    %321 = vector.broadcast %313 : vector<1x128xf32> to vector<16x128xf32>
    %322 = arith.subf %309, %321 : vector<16x128xf32>
    %cst_212 = arith.constant 9.99999974E-6 : f32
    %323 = vector.broadcast %cst_212 : f32 to vector<1x128xf32>
    %324 = arith.addf %320, %323 : vector<1x128xf32>
    %325 = math.rsqrt %324 : vector<1x128xf32>
    %326 = vector.broadcast %325 : vector<1x128xf32> to vector<16x128xf32>
    %327 = arith.mulf %322, %326 : vector<16x128xf32>
    %328 = vector.broadcast %0 : vector<16x1xf32> to vector<16x128xf32>
    %329 = arith.mulf %327, %328 : vector<16x128xf32>
    %330 = vector.broadcast %1 : vector<16x1xf32> to vector<16x128xf32>
    %331 = arith.addf %329, %330 : vector<16x128xf32>
    %332 = arith.negf %331 : vector<16x128xf32>
    %333 = math.exp %332 : vector<16x128xf32>
    %cst_213 = arith.constant 1.000000e+00 : f32
    %334 = vector.broadcast %cst_213 : f32 to vector<16x128xf32>
    %335 = arith.addf %334, %333 : vector<16x128xf32>
    %336 = arith.divf %334, %335 : vector<16x128xf32>
    %c3_214 = arith.constant 3 : index
    %c0_215 = arith.constant 0 : index
    %c0_216 = arith.constant 0 : index
    %337 = vector.load %arg1[%c3_214, %c0_215, %c0_216] : memref<4x16x128xf32, #tpu.memory_space<vmem>>, vector<1x16x128xf32>
    %338 = vector.shape_cast %337 : vector<1x16x128xf32> to vector<16x128xf32>
    %c3_217 = arith.constant 3 : index
    %c0_218 = arith.constant 0 : index
    %c0_219 = arith.constant 0 : index
    %339 = vector.load %arg2[%c3_217, %c0_218, %c0_219] : memref<4x16x128xf32, #tpu.memory_space<vmem>>, vector<1x16x128xf32>
    %340 = vector.shape_cast %339 : vector<1x16x128xf32> to vector<16x128xf32>
    %341 = arith.mulf %340, %336 : vector<16x128xf32>
    %342 = arith.addf %338, %341 : vector<16x128xf32>
    %c3_220 = arith.constant 3 : index
    %c0_221 = arith.constant 0 : index
    %c0_222 = arith.constant 0 : index
    %343 = vector.load %arg8[%c3_220, %c0_221, %c0_222] : memref<4x16x128xf32, #tpu.memory_space<vmem>>, vector<1x16x128xf32>
    %344 = vector.shape_cast %343 : vector<1x16x128xf32> to vector<16x128xf32>
    %345 = vector.shape_cast %342 : vector<16x128xf32> to vector<1x16x128xf32>
    tpu.vector_store %arg8[%c3_220, %c0_221, %c0_222], %345 {strides = array<i32>} : memref<4x16x128xf32, #tpu.memory_space<vmem>>, vector<1x16x128xf32>,
    return
  }
  func.func @transform_0(%arg0: i32) -> (i32, i32, i32) {
    %c0_i32 = arith.constant 0 : i32
    %c0_i32_0 = arith.constant 0 : i32
    %c0_i32_1 = arith.constant 0 : i32
    return %c0_i32, %c0_i32_0, %arg0 : i32, i32, i32
  }
  func.func @transform_1(%arg0: i32) -> (i32, i32, i32) {
    %c0_i32 = arith.constant 0 : i32
    %c0_i32_0 = arith.constant 0 : i32
    %c0_i32_1 = arith.constant 0 : i32
    return %c0_i32, %c0_i32_0, %arg0 : i32, i32, i32
  }
  func.func @transform_2(%arg0: i32) -> (i32, i32) {
    %c0_i32 = arith.constant 0 : i32
    %c0_i32_0 = arith.constant 0 : i32
    %c0_i32_1 = arith.constant 0 : i32
    return %c0_i32, %c0_i32_0 : i32, i32
  }
  func.func @transform_3(%arg0: i32) -> (i32, i32) {
    %c0_i32 = arith.constant 0 : i32
    %c0_i32_0 = arith.constant 0 : i32
    %c0_i32_1 = arith.constant 0 : i32
    return %c0_i32, %c0_i32_0 : i32, i32
  }
  func.func @transform_4(%arg0: i32) -> i32 {
    %c0_i32 = arith.constant 0 : i32
    %c0_i32_0 = arith.constant 0 : i32
    return %c0_i32 : i32
  }
  func.func @transform_5(%arg0: i32) -> (i32, i32) {
    %c0_i32 = arith.constant 0 : i32
    %c0_i32_0 = arith.constant 0 : i32
    %c0_i32_1 = arith.constant 0 : i32
    return %c0_i32, %c0_i32_0 : i32, i32
  }
  func.func @transform_6(%arg0: i32) -> (i32, i32) {
    %c0_i32 = arith.constant 0 : i32
    %c0_i32_0 = arith.constant 0 : i32
    %c0_i32_1 = arith.constant 0 : i32
    return %c0_i32, %c0_i32_0 : i32, i32
  }
  func.func @transform_7(%arg0: i32) -> (i32, i32, i32) {
    %c0_i32 = arith.constant 0 : i32
    %c0_i32_0 = arith.constant 0 : i32
    %c0_i32_1 = arith.constant 0 : i32
    return %c0_i32, %c0_i32_0, %arg0 : i32, i32, i32
  }
}

</mosaic_0001>

<bundles_post_ra>
// kernel: tpu_custom_call.1
= control target key start
LH: loop header
LB: loop body
LE: loop exit
PB: predicated region body
PF: predicated region fallthrough
CT: control target
= control target key end

     0   :  { %12 = vsyncpa [#allocation3], 0  ;;  %s1389_s0 = inlined_call_operand.hbm [shape: f32[4,16,128], index: 0, kind: input, shape index: {}]   ;;  %s1390_s1 = inlined_call_operand.hbm [shape: f32[4,16,128], index: 1, kind: input, shape index: {}]   ;;  %s1391_s2 = inlined_call_operand.vmem [shape: f32[4,4], index: 2, kind: input, shape index: {}]   ;;  %s1392_s3 = inlined_call_operand.vmem [shape: f32[4,4], index: 3, kind: input, shape index: {}]   ;;  %s1393_s4 = inlined_call_operand.vmem [shape: f32[4], index: 4, kind: input, shape index: {}]   ;;  %s1394_s5 = inlined_call_operand.vmem [shape: f32[16,1], index: 5, kind: input, shape index: {}]   ;;  %s1395_s6 = inlined_call_operand.vmem [shape: f32[16,1], index: 6, kind: input, shape index: {}]   ;;  %s1396_s7 = inlined_call_operand.hbm [shape: f32[4,16,128], index: 7, kind: output, shape index: {}]  }
   0x1   :  { %13 = vsyncpa [#allocation7], 0 }
   0x2   :  { %14 = vsyncpa [#allocation5], 0 }
   0x3   :  { %15 = vsyncpa [#allocation10], 0  ;;  %s57_s26 = sshll.u32 %s1392_s3, 4  ;;  %s58_s26 = int_to_ptr.vmem [resolvable:$true] %s57_s26 }
   0x4   :  { %16 = vsyncpa [#allocation4], 0  ;;  %s21_s29 = sshll.u32 %s1389_s0, 4  ;;  %s960_s30 = smov [#allocation9]   ;;  %s22_s29 = int_to_ptr.hbm [resolvable:$true] %s21_s29 }
   0x5   :  { %60 = dma.vmem_to_smem %s58_s26, 64, %s960_s30, [#allocation10]  }
   0x6   :  { %s961_s8 = smov [#allocation2]   ;;  %s962_s10 = smov 128  }
   0x7   :  { %s23_s9 = sshll.u32 %s961_s8, 4  ;;  %s963_s11 = smov 8   ;;  %s24_s9 = int_to_ptr.vmem [resolvable:$true] %s23_s9 }
   0x8   :  { %29 = dma.hbm_to_vmem [thread:$0]  %s22_s29, 1024, %s24_s9, [#allocation3], %s962_s10, %s962_s10, %s963_s11  }
   0x9   :  { %s34_s13 = sshll.u32 %s1390_s1, 4  ;;  %s964_s14 = smov [#allocation6]   ;;  %s35_s13 = int_to_ptr.hbm [resolvable:$true] %s34_s13 }
   0xa   :  { %s36_s15 = sshll.u32 %s964_s14, 4  ;;  %s48_s17 = sshll.u32 %s1391_s2, 4  ;;  %s37_s15 = int_to_ptr.vmem [resolvable:$true] %s36_s15  ;;  %s49_s17 = int_to_ptr.vmem [resolvable:$true] %s48_s17 }
   0xb   :  { %42 = dma.hbm_to_vmem [thread:$0]  %s35_s13, 1024, %s37_s15, [#allocation7], %s962_s10, %s962_s10, %s963_s11  }
   0xc   :  { %s965_s18 = smov [#allocation8]   ;;  %s66_s21 = sshll.u32 %s1393_s4, 4  ;;  %s67_s21 = int_to_ptr.vmem [resolvable:$true] %s66_s21 }
   0xd   :  { %51 = dma.vmem_to_smem %s49_s17, 64, %s965_s18, [#allocation5]  }
   0xe   :  { %s966_s1 = smov [#allocation11]  }
   0xf   :  { %69 = dma.vmem_to_smem %s67_s21, 16, %s966_s1, [#allocation10]  }
  0x10   :  { %950 = dma.done.wait [#allocation3], 1024  }
  0x11   :  { %951 = vsyncadd [#allocation3], 4294966272 }
  0x12   :  { %952 = dma.done.wait [#allocation7], 1024  }
  0x13   :  { %953 = vsyncadd [#allocation7], 4294966272 }
  0x14   :  { %954 = dma.done.wait [#allocation5], 64  }
  0x15   :  { %955 = vsyncadd [#allocation5], 4294967232 }
  0x16   :  { %956 = dma.done.wait [#allocation10], 80  }
  0x17   :  { %957 = vsyncadd [#allocation10], 4294967216 }
  0x18   :  { %94 = sfence }
  0x19   :  { %v97_v0 = vld [vmem:[%s1395_s6] sm:$0xff]  ;;  %v967_v2 = vmov 0   ;;  %s103_s4 = sld [smem:[#allocation8]]  ;;  %v98_v3 = vld [vmem:[%s1395_s6 + $0x8] sm:$0xff]  ;;  %v1074_v16 = vld [vmem:[#allocation2 + $0x10] sm:$0xff] }
  0x1a   :  { %v95_v1 = vld [vmem:[%s1394_s5] sm:$0xff]  ;;  %797 = vset.pattern.permute.xlu1 %v967_v2  ;;  %796 = vset.pattern.permute.xlu0 %v967_v2  ;;  %s107_s25 = sld [smem:[#allocation9]]  ;;  %v96_v4 = vld [vmem:[%s1394_s5 + $0x8] sm:$0xff]  ;;  %v1076_v17 = vld [vmem:[#allocation2 + $0x18] sm:$0xff] }
  0x1b   :  { %225 = vperm.xlu1 %797, %v97_v0   ;;  %213 = vperm.xlu0 %796, %v95_v1   ;;  %s1037_s26 = sld [smem:[#allocation8 + $0x1]]  ;;  %v1059_v5 = vld [vmem:[#allocation2] sm:$0xff]  ;;  %v1061_v6 = vld [vmem:[#allocation2 + $0x8] sm:$0xff]  ;;  %v1082_v20 = vld [vmem:[#allocation6 + $0x10] sm:$0xff]  ;;  %v968_v0 = vmov 16.0  }
  0x1c   :  { %s1039_s27 = sld [smem:[#allocation9 + $0x1]]  ;;  %v1063_v7 = vld [vmem:[#allocation6] sm:$0xff]  ;;  %v1069_v12 = vld [vmem:[#allocation6 + $0x8] sm:$0xff]  ;;  %v1084_v21 = vld [vmem:[#allocation6 + $0x18] sm:$0xff]  ;;  %798 = vrcp.f32 %v968_v0 }
  0x1d   :  { %s1047_s9 = sld [smem:[#allocation8 + $0x2]]  ;;  %v1088_v24 = vld [vmem:[#allocation2 + $0x20] sm:$0xff]  ;;  %v1095_v29 = vld [vmem:[#allocation2 + $0x28] sm:$0xff]  ;;  %v1106_v36 = vld [vmem:[#allocation2 + $0x30] sm:$0xff] }
  0x1e   :  { %s1049_s12 = sld [smem:[#allocation9 + $0x2]]  ;;  %v1097_v30 = vld [vmem:[#allocation6 + $0x20] sm:$0xff]  ;;  %v1099_v31 = vld [vmem:[#allocation6 + $0x28] sm:$0xff]  ;;  %v1108_v37 = vld [vmem:[#allocation2 + $0x38] sm:$0xff] }
  0x1f   :  { %s1051_s3 = sld [smem:[#allocation8 + $0x80]]  ;;  %v104_v8 = vstv %s103_s4  ;;  %v1115_v43 = vld [vmem:[#allocation6 + $0x30] sm:$0xff]  ;;  %v1117_v44 = vld [vmem:[#allocation6 + $0x38] sm:$0xff] }
  0x20   :  { %s1053_s13 = sld [smem:[#allocation8 + $0x3]]  ;;  %v108_v9 = vstv %s107_s25  ;;  %v105_v13 = vmul.f32 %v104_v8, %v1059_v5  ;;  %v106_v14 = vmul.f32 %v104_v8, %v1061_v6 }
  0x21   :  { %s1055_s14 = sld [smem:[#allocation9 + $0x3]]  ;;  %v120_v10 = vstv %s1037_s26  ;;  %v109_v15 = vmul.f32 %v108_v9, %v1063_v7  ;;  %v110_v19 = vmul.f32 %v108_v9, %v1069_v12 }
  0x22   :  { %s1057_s15 = sld [smem:[#allocation11]]  ;;  %v124_v11 = vstv %s1039_s27  ;;  %v121_v22 = vmul.f32 %v120_v10, %v1074_v16  ;;  %v122_v23 = vmul.f32 %v120_v10, %v1076_v17 }
  0x23   :  { %230 = vperm.xlu1 %797, %v98_v3   ;;  %218 = vperm.xlu0 %796, %v96_v4   ;;  %s1067_s5 = sld [smem:[#allocation9 + $0x80]]  ;;  %v138_v25 = vstv %s1047_s9  ;;  %v111_v26 = vadd.f32 %v109_v15, %v105_v13  ;;  %v125_v27 = vmul.f32 %v124_v11, %v1082_v20  ;;  %v126_v28 = vmul.f32 %v124_v11, %v1084_v21 }
  0x24   :  { %s1079_s6 = sld [smem:[#allocation8 + $0x81]]  ;;  %v139_v32 = vmul.f32 %v138_v25, %v1088_v24  ;;  %v112_v33 = vadd.f32 %v110_v19, %v106_v14  ;;  %v140_v34 = vmul.f32 %v138_v25, %v1095_v29  ;;  %v142_v35 = vstv %s1049_s12 }
  0x25   :  { %v284_v18 = vstv %s1051_s3  ;;  %s1091_s0 = sld [smem:[#allocation9 + $0x81]]  ;;  %v127_v39 = vadd.f32 %v125_v27, %v121_v22  ;;  %v128_v40 = vadd.f32 %v126_v28, %v122_v23  ;;  %v143_v41 = vmul.f32 %v142_v35, %v1097_v30 }
  0x26   :  { %s1102_s16 = sld [smem:[#allocation8 + $0x82]]  ;;  %v156_v38 = vstv %s1053_s13  ;;  %v144_v42 = vmul.f32 %v142_v35, %v1099_v31  ;;  %v285_v48 = vmul.f32 %v284_v18, %v1059_v5  ;;  %v286_v55 = vmul.f32 %v284_v18, %v1061_v6 }
  0x27   :  { %s1111_s17 = sld [smem:[#allocation9 + $0x82]]  ;;  %v157_v45 = vmul.f32 %v156_v38, %v1106_v36  ;;  %v158_v46 = vmul.f32 %v156_v38, %v1108_v37  ;;  %v160_v47 = vstv %s1055_s14  ;;  %v129_v49 = vadd.f32 %v127_v39, %v111_v26  ;;  %v799_v38 = vpop.eup %798  ;;  %s969_s14 = smov [#allocation12]  }
  0x28   :  { %s1119_s18 = sld [smem:[#allocation8 + $0x83]]  ;;  %v130_v50 = vadd.f32 %v128_v40, %v112_v33  ;;  %v145_v51 = vadd.f32 %v143_v41, %v139_v32  ;;  %v146_v52 = vadd.f32 %v144_v42, %v140_v34  ;;  %v161_v53 = vmul.f32 %v160_v47, %v1115_v43 }
  0x29   :  { %v162_v54 = vmul.f32 %v160_v47, %v1117_v44  ;;  %v288_v56 = vstv %s1067_s5  ;;  %s1131_s19 = sld [smem:[#allocation9 + $0x83]]  ;;  %v168_v63 = vstv %s1057_s15  ;;  %vm183_vm0 = vweird.f32 %v799_v38  ;;  %s727_s15 = sshll.u32 %s969_s14, 4  ;;  %s728_s15 = int_to_ptr.vmem [resolvable:$true] %s727_s15 }
  0x2a   :  { %v147_v57 = vadd.f32 %v145_v51, %v129_v49  ;;  %v148_v58 = vadd.f32 %v146_v52, %v130_v50  ;;  %v289_v59 = vmul.f32 %v288_v56, %v1063_v7  ;;  %v290_v60 = vmul.f32 %v288_v56, %v1069_v12  ;;  %s1134_s20 = sld [smem:[#allocation11 + $0x1]] }
  0x2b   :  { %v163_v61 = vadd.f32 %v161_v53, %v157_v45  ;;  %v164_v62 = vadd.f32 %v162_v54, %v158_v46  ;;  %v298_v3 = vstv %s1079_s6  ;;  %s1137_s21 = sld [smem:[#allocation8 + $0x100]]  ;;  %v302_v11 = vstv %s1091_s0  ;;  %s729_s0 = sshll.u32 %s1396_s7, 4  ;;  %s730_s0 = int_to_ptr.hbm [resolvable:$true] %s729_s0 }
  0x2c   :  { %v291_v1 = vadd.f32 %v289_v59, %v285_v48  ;;  %v292_v2 = vadd.f32 %v290_v60, %v286_v55  ;;  %v299_v9 = vmul.f32 %v298_v3, %v1074_v16  ;;  %v300_v10 = vmul.f32 %v298_v3, %v1076_v17  ;;  %s1145_s1 = sld [smem:[#allocation9 + $0x100]] }
  0x2d   :  { %v165_v4 = vadd.f32 %v163_v61, %v147_v57  ;;  %v166_v8 = vadd.f32 %v164_v62, %v148_v58  ;;  %v314_v13 = vstv %s1102_s16  ;;  %v318_v14 = vstv %s1111_s17  ;;  %s1153_s2 = sld [smem:[#allocation8 + $0x101]] }
  0x2e   :  { %v330_v15 = vstv %s1119_s18  ;;  %v303_v22 = vmul.f32 %v302_v11, %v1082_v20  ;;  %v304_v23 = vmul.f32 %v302_v11, %v1084_v21  ;;  %v315_v25 = vmul.f32 %v314_v13, %v1088_v24  ;;  %s1164_s22 = sld [smem:[#allocation9 + $0x101]] }
  0x2f   :  { %v1147_v18 = vadd.f32 %v168_v63, %v165_v4  ;;  %v1149_v19 = vadd.f32 %v168_v63, %v166_v8  ;;  %v316_v26 = vmul.f32 %v314_v13, %v1095_v29  ;;  %v319_v27 = vmul.f32 %v318_v14, %v1097_v30  ;;  %s1170_s23 = sld [smem:[#allocation8 + $0x102]] }
  0x30   :  { %v320_v28 = vmul.f32 %v318_v14, %v1099_v31  ;;  %v305_v33 = vadd.f32 %v303_v22, %v299_v9  ;;  %v306_v34 = vadd.f32 %v304_v23, %v300_v10  ;;  %v331_v35 = vmul.f32 %v330_v15, %v1106_v36  ;;  %s1172_s24 = sld [smem:[#allocation9 + $0x102]] }
  0x31   :  { %v171_v32 = vadd.f32 %v1149_v19, %v1147_v18  ;;  %v321_v39 = vadd.f32 %v319_v27, %v315_v25  ;;  %v332_v41 = vmul.f32 %v330_v15, %v1108_v37  ;;  %v334_v42 = vstv %s1131_s19  ;;  %s1176_s4 = sld [smem:[#allocation8 + $0x103]] }
  0x32   :  { %v322_v40 = vadd.f32 %v320_v28, %v316_v26  ;;  %v179_v46 = vmul.f32 16.0, %v799_v38  ;;  %v307_v47 = vadd.f32 %v305_v33, %v291_v1  ;;  %v308_v48 = vadd.f32 %v306_v34, %v292_v2  ;;  %s1180_s25 = sld [smem:[#allocation9 + $0x103]] }
  0x33   :  { %v172_v45 = vrot.slane %v171_v32, 4  ;;  %v335_v49 = vmul.f32 %v334_v42, %v1115_v43  ;;  %v336_v50 = vmul.f32 %v334_v42, %v1117_v44  ;;  %v342_v51 = vstv %s1134_s20  ;;  %s1193_s26 = sld [smem:[#allocation11 + $0x2]] }
  0x34   :  { %v432_v52 = vstv %s1137_s21  ;;  %v180_v54 = vsub.f32 1.0, %v179_v46  ;;  %v323_v55 = vadd.f32 %v321_v39, %v307_v47  ;;  %v324_v56 = vadd.f32 %v322_v40, %v308_v48  ;;  %s1200_s27 = sld [smem:[#allocation8 + $0x180]] }
  0x35   :  { %v173_v53 = vadd.f32 %v172_v45, %v171_v32  ;;  %v337_v57 = vadd.f32 %v335_v49, %v331_v35  ;;  %v338_v58 = vadd.f32 %v336_v50, %v332_v41  ;;  %v433_v59 = vmul.f32 %v432_v52, %v1059_v5  ;;  %s1205_s28 = sld [smem:[#allocation9 + $0x180]] }
  0x36   :  { %v434_v60 = vmul.f32 %v432_v52, %v1061_v6  ;;  %v181_v62 = vmul.f32 %v799_v38, %v180_v54  ;;  %v436_v63 = vstv %s1145_s1  ;;  %v446_v0 = vstv %s1153_s2  ;;  %s1208_s29 = sld [smem:[#allocation8 + $0x181]] }
  0x37   :  { %v174_v61 = vrot.slane %v173_v53, 2  ;;  %v339_v1 = vadd.f32 %v337_v57, %v323_v55  ;;  %v340_v2 = vadd.f32 %v338_v58, %v324_v56  ;;  %v437_v3 = vmul.f32 %v436_v63, %v1063_v7  ;;  %s1214_s30 = sld [smem:[#allocation9 + $0x181]] }
  0x38   :  { %v438_v4 = vmul.f32 %v436_v63, %v1069_v12  ;;  %v182_v9 = vadd.f32 %v799_v38, %v181_v62  ;;  %v447_v10 = vmul.f32 %v446_v0, %v1074_v16  ;;  %v448_v11 = vmul.f32 %v446_v0, %v1076_v17  ;;  %s1223_s8 = sld [smem:[#allocation8 + $0x182]] }
  0x39   :  { %v175_v8 = vadd.f32 %v174_v61, %v173_v53  ;;  %v1186_v13 = vadd.f32 %v342_v51, %v339_v1  ;;  %v1188_v14 = vadd.f32 %v342_v51, %v340_v2  ;;  %v439_v15 = vadd.f32 %v437_v3, %v433_v59  ;;  %s1227_s9 = sld [smem:[#allocation9 + $0x182]] }
  0x3a   :  { %v1190_v23 = vsel %vm183_vm0, %v799_v38, %v182_v9  ;;  %v440_v25 = vadd.f32 %v438_v4, %v434_v60  ;;  %v450_v26 = vstv %s1164_s22  ;;  %v462_v33 = vstv %s1170_s23  ;;  %s1246_s12 = sld [smem:[#allocation8 + $0x183]] }
  0x3b   :  { %v176_v22 = vrot.slane %v175_v8, 1  ;;  %v345_v27 = vadd.f32 %v1188_v14, %v1186_v13  ;;  %v451_v28 = vmul.f32 %v450_v26, %v1082_v20  ;;  %v452_v32 = vmul.f32 %v450_v26, %v1084_v21  ;;  %s1252_s3 = sld [smem:[#allocation9 + $0x183]] }
  0x3c   :  { %v463_v35 = vmul.f32 %v462_v33, %v1088_v24  ;;  %v464_v38 = vmul.f32 %v462_v33, %v1095_v29  ;;  %v466_v39 = vstv %s1172_s24  ;;  %v478_v48 = vstv %s1176_s4  ;;  %s1271_s13 = sld [smem:[#allocation11 + $0x3]] }
  0x3d   :  { %v177_v34 = vadd.f32 %v176_v22, %v175_v8  ;;  %v346_v40 = vrot.slane %v345_v27, 4  ;;  %v453_v41 = vadd.f32 %v451_v28, %v447_v10  ;;  %v454_v42 = vadd.f32 %v452_v32, %v448_v11 }
  0x3e   :  { %v467_v45 = vmul.f32 %v466_v39, %v1097_v30  ;;  %v468_v47 = vmul.f32 %v466_v39, %v1099_v31  ;;  %v482_v49 = vstv %s1180_s25  ;;  %v479_v57 = vmul.f32 %v478_v48, %v1106_v36 }
  0x3f   :  { %v185_v46 = vmul.f32 %v1190_v23, %v177_v34  ;;  %v347_v50 = vadd.f32 %v346_v40, %v345_v27  ;;  %v455_v51 = vadd.f32 %v453_v41, %v439_v15  ;;  %v456_v52 = vadd.f32 %v454_v42, %v440_v25 }
  0x40   :  { %v469_v53 = vadd.f32 %v467_v45, %v463_v35  ;;  %v470_v56 = vadd.f32 %v468_v47, %v464_v38  ;;  %v480_v60 = vmul.f32 %v478_v48, %v1108_v37  ;;  %v483_v61 = vmul.f32 %v482_v49, %v1115_v43 }
  0x41   :  { %v1217_v54 = vsub.f32 %v1147_v18, %v185_v46  ;;  %v1220_v55 = vsub.f32 %v1149_v19, %v185_v46  ;;  %v348_v58 = vrot.slane %v347_v50, 2  ;;  %v484_v63 = vmul.f32 %v482_v49, %v1117_v44 }
  0x42   :  { %v471_v59 = vadd.f32 %v469_v53, %v455_v51  ;;  %v472_v62 = vadd.f32 %v470_v56, %v456_v52  ;;  %v485_v1 = vadd.f32 %v483_v61, %v479_v57  ;;  %v490_v2 = vstv %s1193_s26 }
  0x43   :  { %v188_v18 = vmul.f32 %v1217_v54, %v1217_v54  ;;  %v189_v19 = vmul.f32 %v1220_v55, %v1220_v55  ;;  %v349_v0 = vadd.f32 %v348_v58, %v347_v50  ;;  %v580_v3 = vstv %s1200_s27 }
  0x44   :  { %v486_v8 = vadd.f32 %v484_v63, %v480_v60  ;;  %v581_v9 = vmul.f32 %v580_v3, %v1059_v5  ;;  %v582_v10 = vmul.f32 %v580_v3, %v1061_v6  ;;  %v487_v15 = vadd.f32 %v485_v1, %v471_v59 }
  0x45   :  { %v190_v4 = vadd.f32 %v189_v19, %v188_v18  ;;  %v350_v11 = vrot.slane %v349_v0, 1  ;;  %v584_v22 = vstv %s1205_s28  ;;  %v594_v25 = vstv %s1208_s29 }
  0x46   :  { %v488_v27 = vadd.f32 %v486_v8, %v472_v62  ;;  %v585_v28 = vmul.f32 %v584_v22, %v1063_v7  ;;  %v586_v32 = vmul.f32 %v584_v22, %v1069_v12  ;;  %v1242_v34 = vadd.f32 %v490_v2, %v487_v15 }
  0x47   :  { %v191_v26 = vrot.slane %v190_v4, 4  ;;  %v351_v33 = vadd.f32 %v350_v11, %v349_v0  ;;  %v595_v35 = vmul.f32 %v594_v25, %v1074_v16  ;;  %v596_v38 = vmul.f32 %v594_v25, %v1076_v17 }
  0x48   :  { %v492_v40 = vadd.f32 %v490_v2, %v488_v27  ;;  %v587_v41 = vadd.f32 %v585_v28, %v581_v9  ;;  %v588_v42 = vadd.f32 %v586_v32, %v582_v10  ;;  %v598_v46 = vstv %s1214_s30 }
  0x49   :  { %v192_v39 = vadd.f32 %v191_v26, %v190_v4  ;;  %v352_v45 = vmul.f32 %v351_v33, %v1190_v23  ;;  %v610_v47 = vstv %s1223_s8  ;;  %v614_v48 = vstv %s1227_s9 }
  0x4a   :  { %v493_v50 = vadd.f32 %v492_v40, %v1242_v34  ;;  %v599_v51 = vmul.f32 %v598_v46, %v1082_v20  ;;  %v600_v52 = vmul.f32 %v598_v46, %v1084_v21  ;;  %v611_v57 = vmul.f32 %v610_v47, %v1088_v24 }
  0x4b   :  { %v193_v49 = vrot.slane %v192_v39, 2  ;;  %v1258_v53 = vsub.f32 %v1186_v13, %v352_v45  ;;  %v1261_v56 = vsub.f32 %v1188_v14, %v352_v45  ;;  %v612_v58 = vmul.f32 %v610_v47, %v1095_v29 }
  0x4c   :  { %v494_v60 = vrot.slane %v493_v50, 4  ;;  %v601_v61 = vadd.f32 %v599_v51, %v595_v35  ;;  %v602_v18 = vadd.f32 %v600_v52, %v596_v38  ;;  %v615_v13 = vmul.f32 %v614_v48, %v1097_v30 }
  0x4d   :  { %v194_v59 = vadd.f32 %v193_v49, %v192_v39  ;;  %v355_v19 = vmul.f32 %v1258_v53, %v1258_v53  ;;  %v356_v62 = vmul.f32 %v1261_v56, %v1261_v56  ;;  %v616_v14 = vmul.f32 %v614_v48, %v1099_v31 }
  0x4e   :  { %v495_v63 = vadd.f32 %v494_v60, %v493_v50  ;;  %v603_v29 = vadd.f32 %v601_v61, %v587_v41  ;;  %v604_v0 = vadd.f32 %v602_v18, %v588_v42  ;;  %v617_v2 = vadd.f32 %v615_v13, %v611_v57 }
  0x4f   :  { %v357_v1 = vadd.f32 %v356_v62, %v355_v19  ;;  %v618_v3 = vadd.f32 %v616_v14, %v612_v58  ;;  %v626_v4 = vstv %s1246_s12  ;;  %v195_v11 = vrot.slane %v194_v59, 1 }
  0x50   :  { %v496_v8 = vrot.slane %v495_v63, 2  ;;  %v627_v9 = vmul.f32 %v626_v4, %v1106_v36  ;;  %v628_v10 = vmul.f32 %v626_v4, %v1108_v37  ;;  %v619_v22 = vadd.f32 %v617_v2, %v603_v29 }
  0x51   :  { %v358_v15 = vrot.slane %v357_v1, 4  ;;  %v630_v25 = vstv %s1252_s3  ;;  %v620_v27 = vadd.f32 %v618_v3, %v604_v0  ;;  %v638_v42 = vstv %s1271_s13 }
  0x52   :  { %v497_v26 = vadd.f32 %v496_v8, %v495_v63  ;;  %v631_v28 = vmul.f32 %v630_v25, %v1115_v43  ;;  %v632_v32 = vmul.f32 %v630_v25, %v1117_v44  ;;  %v196_v45 = vadd.f32 %v195_v11, %v194_v59 }
  0x53   :  { %v359_v33 = vadd.f32 %v358_v15, %v357_v1 }
  0x54   :  { %v498_v35 = vrot.slane %v497_v26, 1  ;;  %v633_v38 = vadd.f32 %v631_v28, %v627_v9  ;;  %v634_v39 = vadd.f32 %v632_v32, %v628_v10  ;;  %v197_v57 = vmul.f32 %v196_v45, %v1190_v23 }
  0x55   :  { %v360_v41 = vrot.slane %v359_v33, 2 }
  0x56   :  { %v499_v46 = vadd.f32 %v498_v35, %v497_v26  ;;  %v635_v47 = vadd.f32 %v633_v38, %v619_v22  ;;  %v636_v37 = vadd.f32 %v634_v39, %v620_v27  ;;  %v198_v14 = vadd.f32 1e-05, %v197_v57 }
  0x57   :  { %v361_v48 = vadd.f32 %v360_v41, %v359_v33 }
  0x58   :  { %v500_v49 = vmul.f32 %v499_v46, %v1190_v23  ;;  %v639_v50 = vadd.f32 %v638_v42, %v635_v47  ;;  %v640_v51 = vadd.f32 %v638_v42, %v636_v37  ;;  %800 = vrsqrt.f32 %v198_v14 }
  0x59   :  { %v362_v52 = vrot.slane %v361_v48, 1  ;;  %vm205_vm1 = vweird.f32 %v198_v14 }
  0x5a   :  { %v1283_v58 = vsub.f32 %v1242_v34, %v500_v49  ;;  %v1285_v60 = vsub.f32 %v492_v40, %v500_v49  ;;  %v641_v61 = vadd.f32 %v640_v51, %v639_v50 }
  0x5b   :  { %v363_v18 = vadd.f32 %v362_v52, %v361_v48 }
  0x5c   :  { %v503_v59 = vmul.f32 %v1283_v58, %v1283_v58  ;;  %v504_v19 = vmul.f32 %v1285_v60, %v1285_v60  ;;  %v642_v62 = vrot.slane %v641_v61, 4 }
  0x5d   :  { %v364_v13 = vmul.f32 %v363_v18, %v1190_v23 }
  0x5e   :  { %v505_v63 = vadd.f32 %v504_v19, %v503_v59  ;;  %v643_v29 = vadd.f32 %v642_v62, %v641_v61  ;;  %v801_v10 = vpop.eup %800 }
  0x5f   :  { %v365_v0 = vadd.f32 1e-05, %v364_v13  ;;  %v200_v28 = vmul.f32 %v801_v10, %v198_v14  ;;  %vm206_vm2 = vweird.f32 %v801_v10 }
  0x60   :  { %v506_v1 = vrot.slane %v505_v63, 4  ;;  %v644_v34 = vrot.slane %v643_v29, 2  ;;  %vm207_vm7 = vmor %vm205_vm1, %vm206_vm2 }
  0x61   :  { %802 = vrsqrt.f32 %v365_v0  ;;  %v201_v42 = vmul.f32 %v801_v10, %v200_v28  ;;  %vm372_vm3 = vweird.f32 %v365_v0 }
  0x62   :  { %v507_v40 = vadd.f32 %v506_v1, %v505_v63  ;;  %v645_v2 = vadd.f32 %v644_v34, %v643_v29 }
  0x63   :  { %v202_v37 = vmul.f32 0.5, %v201_v42 }
  0x64   :  { %v508_v3 = vrot.slane %v507_v40, 2  ;;  %v646_v4 = vrot.slane %v645_v2, 1 }
  0x65   :  { %v203_v57 = vsub.f32 1.5, %v202_v37 }
  0x66   :  { %v509_v8 = vadd.f32 %v508_v3, %v507_v40  ;;  %v647_v9 = vadd.f32 %v646_v4, %v645_v2 }
  0x67   :  { %v803_v15 = vpop.eup %802  ;;  %v204_v13 = vmul.f32 %v801_v10, %v203_v57 }
  0x68   :  { %v510_v11 = vrot.slane %v509_v8, 1  ;;  %v648_v22 = vmul.f32 %v647_v9, %v1190_v23  ;;  %v367_v32 = vmul.f32 %v803_v15, %v365_v0  ;;  %vm373_vm4 = vweird.f32 %v803_v15 }
  0x69   :  { %vm374_vm8 = vmor %vm372_vm3, %vm373_vm4  ;;  %v208_v14 = vsel %vm207_vm7, %v801_v10, %v204_v13 }
  0x6a   :  { %v511_v25 = vadd.f32 %v510_v11, %v509_v8  ;;  %v1293_v26 = vsub.f32 %v639_v50, %v648_v22  ;;  %v1295_v27 = vsub.f32 %v640_v51, %v648_v22  ;;  %v368_v45 = vmul.f32 %v803_v15, %v367_v32 }
  0x6b   :  { %v209_v0 = vmul.f32 %v208_v14, %v1217_v54 }
  0x6c   :  { %v512_v33 = vmul.f32 %v511_v25, %v1190_v23  ;;  %v651_v35 = vmul.f32 %v1293_v26, %v1293_v26  ;;  %v652_v38 = vmul.f32 %v1295_v27, %v1295_v27  ;;  %v369_v48 = vmul.f32 0.5, %v368_v45 }
  0x6e   :  { %v513_v39 = vadd.f32 1e-05, %v512_v33  ;;  %v653_v41 = vadd.f32 %v652_v38, %v651_v35  ;;  %v370_v61 = vsub.f32 1.5, %v369_v48 }
  0x70   :  { %804 = vrsqrt.f32 %v513_v39  ;;  %v654_v46 = vrot.slane %v653_v41, 4  ;;  %vm520_vm5 = vweird.f32 %v513_v39  ;;  %v371_v63 = vmul.f32 %v803_v15, %v370_v61 }
  0x72   :  { %v655_v47 = vadd.f32 %v654_v46, %v653_v41  ;;  %v375_v2 = vsel %vm374_vm8, %v803_v15, %v371_v63  ;;  %v210_v15 = vmul.f32 %v208_v14, %v1220_v55 }
  0x73   :  { %v376_v4 = vmul.f32 %v375_v2, %v1258_v53  ;;  %v377_v53 = vmul.f32 %v375_v2, %v1261_v56 }
  0x74   :  { %v656_v49 = vrot.slane %v655_v47, 2 }
  0x76   :  { %v805_v50 = vpop.eup %804  ;;  %v657_v52 = vadd.f32 %v656_v49, %v655_v47 }
  0x77   :  { %v515_v51 = vmul.f32 %v805_v50, %v513_v39  ;;  %vm521_vm6 = vweird.f32 %v805_v50 }
  0x78   :  { %v658_v59 = vrot.slane %v657_v52, 1  ;;  %vm522_vm9 = vmor %vm520_vm5, %vm521_vm6 }
  0x79   :  { %v516_v18 = vmul.f32 %v805_v50, %v515_v51 }
  0x7a   :  { %v659_v62 = vadd.f32 %v658_v59, %v657_v52 }
  0x7b   :  { %v517_v19 = vmul.f32 0.5, %v516_v18 }
  0x7c   :  { %v660_v1 = vmul.f32 %v659_v62, %v1190_v23 }
  0x7d   :  { %v518_v29 = vsub.f32 1.5, %v517_v19 }
  0x7e   :  { %v661_v40 = vadd.f32 1e-05, %v660_v1 }
  0x7f   :  { %v519_v34 = vmul.f32 %v805_v50, %v518_v29 }
  0x80   :  { %806 = vrsqrt.f32 %v661_v40  ;;  %vm668_vm10 = vweird.f32 %v661_v40 }
  0x81   :  { %v523_v3 = vsel %vm522_vm9, %v805_v50, %v519_v34 }
  0x82   :  { %v524_v8 = vmul.f32 %v523_v3, %v1283_v58  ;;  %v525_v46 = vmul.f32 %v523_v3, %v1285_v60 }
  0x86   :  { %v807_v22 = vpop.eup %806 }
  0x87   :  { %v663_v23 = vmul.f32 %v807_v22, %v661_v40  ;;  %vm669_vm11 = vweird.f32 %v807_v22 }
  0x88   :  { %vm670_vm12 = vmor %vm668_vm10, %vm669_vm11 }
  0x89   :  { %v664_v10 = vmul.f32 %v807_v22, %v663_v23 }
  0x8b   :  { %v665_v42 = vmul.f32 0.5, %v664_v10 }
  0x8d   :  { %v226_v9 = vpop.permute.xlu1 %225  ;;  %v214_v11 = vpop.permute.xlu0 %213  ;;  %v666_v58 = vsub.f32 1.5, %v665_v42 }
  0x8e   :  { %v221_v25 = vmul.f32 %v214_v11, %v209_v0  ;;  %v378_v28 = vmul.f32 %v376_v4, %v214_v11  ;;  %v526_v32 = vmul.f32 %v524_v8, %v214_v11 }
  0x8f   :  { %v667_v48 = vmul.f32 %v807_v22, %v666_v58 }
  0x90   :  { %v233_v33 = vadd.f32 %v226_v9, %v221_v25  ;;  %v380_v35 = vadd.f32 %v378_v28, %v226_v9  ;;  %v528_v38 = vadd.f32 %v526_v32, %v226_v9 }
  0x91   :  { %v671_v51 = vsel %vm670_vm12, %v807_v22, %v667_v48 }
  0x92   :  { %v751_v39 = vmul.f32 -1.442695, %v233_v33  ;;  %v762_v41 = vmul.f32 -1.442695, %v380_v35  ;;  %v773_v54 = vmul.f32 -1.442695, %v528_v38  ;;  %v672_v56 = vmul.f32 %v671_v51, %v1293_v26 }
  0x93   :  { %v673_v19 = vmul.f32 %v671_v51, %v1295_v27 }
  0x94   :  { %808 = vpow2.f32 %v751_v39  ;;  %v674_v63 = vmul.f32 %v672_v56, %v214_v11 }
  0x95   :  { %810 = vpow2.f32 %v762_v41  ;;  %v219_v45 = vpop.permute.xlu0 %218  ;;  %v231_v55 = vpop.permute.xlu1 %230 }
  0x96   :  { %812 = vpow2.f32 %v773_v54  ;;  %v222_v47 = vmul.f32 %v219_v45, %v210_v15  ;;  %v379_v37 = vmul.f32 %v377_v53, %v219_v45  ;;  %v527_v61 = vmul.f32 %v525_v46, %v219_v45 }
  0x97   :  { %v676_v34 = vadd.f32 %v674_v63, %v226_v9  ;;  %v675_v40 = vmul.f32 %v673_v19, %v219_v45 }
  0x98   :  { %v234_v49 = vadd.f32 %v231_v55, %v222_v47  ;;  %v381_v50 = vadd.f32 %v379_v37, %v231_v55  ;;  %v529_v29 = vadd.f32 %v527_v61, %v231_v55 }
  0x99   :  { %v784_v2 = vmul.f32 -1.442695, %v676_v34  ;;  %v677_v8 = vadd.f32 %v675_v40, %v231_v55 }
  0x9a   :  { %v809_v52 = vpop.eup %808  ;;  %v752_v57 = vmul.f32 -1.442695, %v234_v49  ;;  %v763_v60 = vmul.f32 -1.442695, %v381_v50  ;;  %v774_v3 = vmul.f32 -1.442695, %v529_v29 }
  0x9b   :  { %v811_v18 = vpop.eup %810  ;;  %v241_v59 = vadd.f32 1.0, %v809_v52  ;;  %v785_v39 = vmul.f32 -1.442695, %v677_v8 }
  0x9c   :  { %v813_v62 = vpop.eup %812  ;;  %v388_v13 = vadd.f32 1.0, %v811_v18  ;;  %814 = vpow2.f32 %v752_v57 }
  0x9d   :  { %816 = vrcp.f32 %v241_v59  ;;  %v1311_v1 = vadd.f32 1.0, %v813_v62  ;;  %v252_v14 = vand.u32 2147483647, %v241_v59  ;;  %v254_v0 = vand.u32 2147483648, %v241_v59 }
  0x9e   :  { %818 = vrcp.f32 %v388_v13  ;;  %v399_v25 = vand.u32 2147483647, %v388_v13  ;;  %vm248_vm13 = vweird.f32 %v241_v59  ;;  %vm395_vm14 = vweird.f32 %v388_v13 }
  0x9f   :  { %820 = vpow2.f32 %v763_v60  ;;  %vm1317_vm15 = vcmp.eq.f32.partialorder %v252_v14, 8.507059e+37  ;;  %v401_v33 = vand.u32 2147483648, %v388_v13  ;;  %v255_v38 = vor.u32 1.1754944e-38, %v254_v0 }
  0xa0   :  { %822 = vrcp.f32 %v1311_v1  ;;  %vm1323_vm1 = vcmp.eq.f32.partialorder %v399_v25, 8.507059e+37  ;;  %v547_v58 = vand.u32 2147483647, %v1311_v1  ;;  %vm543_vm3 = vweird.f32 %v1311_v1 }
  0xa1   :  { %824 = vpow2.f32 %v784_v2  ;;  %v402_v47 = vor.u32 1.1754944e-38, %v401_v33  ;;  %v549_v49 = vand.u32 2147483648, %v1311_v1 }
  0xa2   :  { %v815_v26 = vpop.eup %814  ;;  %vm1340_vm7 = vcmp.eq.f32.partialorder %v547_v58, 8.507059e+37 }
  0xa3   :  { %v817_v27 = vpop.eup %816  ;;  %v1314_v4 = vadd.f32 1.0, %v815_v26  ;;  %v550_v34 = vor.u32 1.1754944e-38, %v549_v49 }
  0xa4   :  { %v819_v11 = vpop.eup %818  ;;  %v244_v22 = vmul.f32 %v817_v27, %v241_v59  ;;  %vm249_vm0 = vweird.f32 %v817_v27 }
  0xa5   :  { %v391_v28 = vmul.f32 %v819_v11, %v388_v13  ;;  %826 = vrcp.f32 %v1314_v4  ;;  %v821_v9 = vpop.eup %820  ;;  %vm396_vm2 = vweird.f32 %v819_v11  ;;  %vm250_vm4 = vmor %vm248_vm13, %vm249_vm0  ;;  %v269_v63 = vand.u32 2147483648, %v1314_v4 }
  0xa6   :  { %v245_v32 = vsub.f32 1.0, %v244_v22  ;;  %828 = vpow2.f32 %v774_v3  ;;  %v823_v35 = vpop.eup %822  ;;  %v1321_v15 = vadd.f32 1.0, %v821_v9  ;;  %vm397_vm5 = vmor %vm395_vm14, %vm396_vm2  ;;  %vm263_vm10 = vweird.f32 %v1314_v4 }
  0xa7   :  { %v392_v10 = vsub.f32 1.0, %v391_v28  ;;  %v539_v53 = vmul.f32 %v823_v35, %v1311_v1  ;;  %v825_v45 = vpop.eup %824  ;;  %vm544_vm6 = vweird.f32 %v823_v35 }
  0xa8   :  { %v246_v41 = vmul.f32 %v817_v27, %v245_v32  ;;  %830 = vrcp.f32 %v1321_v15  ;;  %v1333_v50 = vadd.f32 1.0, %v825_v45  ;;  %vm545_vm8 = vmor %vm543_vm3, %vm544_vm6  ;;  %v414_v28 = vand.u32 2147483647, %v1321_v15 }
  0xa9   :  { %v393_v42 = vmul.f32 %v819_v11, %v392_v10  ;;  %v540_v37 = vsub.f32 1.0, %v539_v53  ;;  %832 = vpow2.f32 %v785_v39  ;;  %v416_v9 = vand.u32 2147483648, %v1321_v15 }
  0xaa   :  { %v247_v46 = vadd.f32 %v817_v27, %v246_v41  ;;  %834 = vrcp.f32 %v1333_v50  ;;  %vm410_vm14 = vweird.f32 %v1321_v15  ;;  %v697_v39 = vand.u32 2147483648, %v1333_v50 }
  0xab   :  { %v827_v48 = vpop.eup %826  ;;  %v394_v55 = vadd.f32 %v819_v11, %v393_v42  ;;  %v541_v56 = vmul.f32 %v823_v35, %v540_v37  ;;  %v417_v41 = vor.u32 1.1754944e-38, %v416_v9  ;;  %vm691_vm2 = vweird.f32 %v1333_v50 }
  0xac   :  { %v829_v51 = vpop.eup %828  ;;  %v251_v52 = vsel %vm250_vm4, %v817_v27, %v247_v46  ;;  %v259_v57 = vmul.f32 %v827_v48, %v1314_v4  ;;  %vm264_vm9 = vweird.f32 %v827_v48 }
  0xad   :  { %v256_v61 = vsel %vm1317_vm15, %v255_v38, %v251_v52  ;;  %v398_v18 = vsel %vm397_vm5, %v819_v11, %v394_v55  ;;  %v542_v13 = vadd.f32 %v823_v35, %v541_v56  ;;  %v1352_v26 = vadd.f32 1.0, %v829_v51  ;;  %vm265_vm11 = vmor %vm263_vm10, %vm264_vm9 }
  0xae   :  { %v273_v19 = vmul.f32 %v256_v61, %v1063_v7  ;;  %v403_v62 = vsel %vm1323_vm1, %v402_v47, %v398_v18  ;;  %v831_v60 = vpop.eup %830  ;;  %v260_v40 = vsub.f32 1.0, %v259_v57  ;;  %v267_v7 = vand.u32 2147483647, %v1314_v4 }
  0xaf   :  { %v420_v29 = vmul.f32 %v403_v62, %v1082_v20  ;;  %v546_v2 = vsel %vm545_vm8, %v823_v35, %v542_v13  ;;  %v406_v3 = vmul.f32 %v831_v60, %v1321_v15  ;;  %v833_v27 = vpop.eup %832  ;;  %v270_v11 = vor.u32 1.1754944e-38, %v269_v63 }
  0xb0   :  { %v275_v14 = vadd.f32 %v273_v19, %v1059_v5  ;;  %v551_v20 = vsel %vm1340_vm7, %v550_v34, %v546_v2  ;;  %v261_v8 = vmul.f32 %v827_v48, %v260_v40  ;;  %v835_v22 = vpop.eup %834  ;;  %836 = vrcp.f32 %v1352_v26  ;;  %v840_v34 = vld [vmem:[#allocation2 + $0x28] sm:$0xff]  ;;  %v841_v2 = vld [vmem:[#allocation2 + $0x38] sm:$0xff] }
  0xb1   :  { %v422_v0 = vadd.f32 %v420_v29, %v1074_v16  ;;  %v568_v1 = vmul.f32 %v551_v20, %v1097_v30  ;;  %v407_v5 = vsub.f32 1.0, %v406_v3  ;;  %v687_v32 = vmul.f32 %v835_v22, %v1333_v50 }
  0xb2   :  { %277 = vst [vmem:[#allocation12] sm:$0xff] %v275_v14  ;;  %v262_v25 = vadd.f32 %v827_v48, %v261_v8  ;;  %vm411_vm12 = vweird.f32 %v831_v60  ;;  %vm268_vm13 = vcmp.eq.f32.partialorder %v267_v7, 8.507059e+37  ;;  %v685_v4 = vadd.f32 1.0, %v833_v27 }
  0xb3   :  { %425 = vst [vmem:[#allocation12 + $0x10] sm:$0xff] %v422_v0  ;;  %v570_v16 = vadd.f32 %v568_v1, %v1088_v24  ;;  %v408_v23 = vmul.f32 %v831_v60, %v407_v5  ;;  %v688_v33 = vsub.f32 1.0, %v687_v32  ;;  %v695_v35 = vand.u32 2147483647, %v1333_v50  ;;  %vm412_vm15 = vmor %vm410_vm14, %vm411_vm12 }
  0xb4   :  { %v266_v30 = vsel %vm265_vm11, %v827_v48, %v262_v25  ;;  %838 = vrcp.f32 %v685_v4  ;;  %vm692_vm0 = vweird.f32 %v835_v22  ;;  %vm415_vm1 = vcmp.eq.f32.partialorder %v414_v28, 8.507059e+37 }
  0xb5   :  { %573 = vst [vmem:[#allocation12 + $0x20] sm:$0xff] %v570_v16  ;;  %v271_v38 = vsel %vm268_vm13, %v270_v11, %v266_v30  ;;  %v409_v10 = vadd.f32 %v831_v60, %v408_v23  ;;  %v689_v54 = vmul.f32 %v835_v22, %v688_v33  ;;  %vm693_vm3 = vmor %vm691_vm2, %vm692_vm0  ;;  %vm696_vm4 = vcmp.eq.f32.partialorder %v695_v35, 8.507059e+37 }
  0xb6   :  { %v274_v24 = vmul.f32 %v271_v38, %v1069_v12  ;;  %v837_v42 = vpop.eup %836  ;;  %v698_v12 = vor.u32 1.1754944e-38, %v697_v39  ;;  %v562_v52 = vand.u32 2147483647, %v1352_v26  ;;  %vm558_vm6 = vweird.f32 %v1352_v26 }
  0xb7   :  { %v413_v53 = vsel %vm412_vm15, %v831_v60, %v409_v10  ;;  %v690_v45 = vadd.f32 %v835_v22, %v689_v54  ;;  %v554_v47 = vmul.f32 %v837_v42, %v1352_v26  ;;  %vm559_vm5 = vweird.f32 %v837_v42 }
  0xb8   :  { %v418_v15 = vsel %vm415_vm1, %v417_v41, %v413_v53  ;;  %v276_v58 = vadd.f32 %v274_v24, %v1061_v6  ;;  %v564_v6 = vand.u32 2147483648, %v1352_v26  ;;  %vm560_vm7 = vmor %vm558_vm6, %vm559_vm5  ;;  %vm563_vm8 = vcmp.eq.f32.partialorder %v562_v52, 8.507059e+37 }
  0xb9   :  { %v421_v46 = vmul.f32 %v418_v15, %v1084_v21  ;;  %v694_v37 = vsel %vm693_vm3, %v835_v22, %v690_v45  ;;  %v555_v48 = vsub.f32 1.0, %v554_v47  ;;  %v712_v59 = vand.u32 2147483648, %v685_v4 }
  0xba   :  { %278 = vst [vmem:[#allocation12 + $0x8] sm:$0xff] %v276_v58  ;;  %v839_v49 = vpop.eup %838  ;;  %v699_v51 = vsel %vm696_vm4, %v698_v12, %v694_v37  ;;  %v710_v13 = vand.u32 2147483647, %v685_v4  ;;  %vm706_vm10 = vweird.f32 %v685_v4 }
  0xbb   :  { %v423_v55 = vadd.f32 %v421_v46, %v1076_v17  ;;  %v716_v50 = vmul.f32 %v699_v51, %v1115_v43  ;;  %v556_v56 = vmul.f32 %v837_v42, %v555_v48  ;;  %v702_v21 = vmul.f32 %v839_v49, %v685_v4 }
  0xbc   :  { %v565_v17 = vor.u32 1.1754944e-38, %v564_v6  ;;  %vm707_vm9 = vweird.f32 %v839_v49  ;;  %vm711_vm12 = vcmp.eq.f32.partialorder %v710_v13, 8.507059e+37 }
  0xbd   :  { %426 = vst [vmem:[#allocation12 + $0x18] sm:$0xff] %v423_v55  ;;  %v718_v57 = vadd.f32 %v716_v50, %v1106_v36  ;;  %v557_v61 = vadd.f32 %v837_v42, %v556_v56  ;;  %v703_v18 = vsub.f32 1.0, %v702_v21  ;;  %vm708_vm11 = vmor %vm706_vm10, %vm707_vm9  ;;  %v713_v36 = vor.u32 1.1754944e-38, %v712_v59 }
  0xbf   :  { %721 = vst [vmem:[#allocation12 + $0x30] sm:$0xff] %v718_v57  ;;  %v561_v19 = vsel %vm560_vm7, %v837_v42, %v557_v61  ;;  %v704_v62 = vmul.f32 %v839_v49, %v703_v18 }
  0xc0   :  { %v566_v43 = vsel %vm563_vm8, %v565_v17, %v561_v19 }
  0xc1   :  { %v569_v63 = vmul.f32 %v566_v43, %v1099_v31  ;;  %v705_v60 = vadd.f32 %v839_v49, %v704_v62 }
  0xc3   :  { %v709_v29 = vsel %vm708_vm11, %v839_v49, %v705_v60  ;;  %v571_v40 = vadd.f32 %v840_v34, %v569_v63 }
  0xc4   :  { %v714_v26 = vsel %vm711_vm12, %v713_v36, %v709_v29 }
  0xc5   :  { %v717_v14 = vmul.f32 %v714_v26, %v1117_v44  ;;  %574 = vst [vmem:[#allocation12 + $0x28] sm:$0xff] %v571_v40 }
  0xc7   :  { %v719_v31 = vadd.f32 %v841_v2, %v717_v14 }
  0xc9   :  { %722 = vst [vmem:[#allocation12 + $0x38] sm:$0xff] %v719_v31 }
  0xca   :  { %735 = dma.vmem_to_hbm [thread:$0]  %s728_s15, 1024, %s730_s0, [#allocation4], %s962_s10, %s962_s10, %s963_s11  }
  0xcb   :  { %958 = dma.done.wait [#allocation4], 1024  }
  0xcc   :  { %959 = vsyncadd [#allocation4], 4294966272 }
  0xcd   :  { %740 = vsyncpa [#allocation3], 1 }
  0xce   :  { %741 = vsyncpa [#allocation7], 1 }
  0xcf   :  { %742 = vsyncpa [#allocation4], 1 }
  0xd0   :  { %743 = vsyncpa [#allocation5], 1 }
  0xd1   :  { %744 = vsyncpa [#allocation10], 1 }

</bundles_post_ra>
